<compile_context>
chip_gen: v7x
topology: tpu7x:2x2x1
jax: 0.10.0
libtpu: 0.0.40
codegen_flags: <defaults>
</compile_context>

<pallas_src>
import jax
import jax.numpy as jnp
from jax import lax
from jax.experimental import pallas as pl
from jax.experimental.pallas import tpu as pltpu


def _encoder_kernel(desc_ref, w1x_ref, w1g_ref, b1_ref, w2_ref, b2_ref, out_ref):
    # desc_ref/out_ref: (Bt, D, Npad)
    # w1x_ref/w1g_ref : (2D, D)   b1_ref: (2D, 1)   (eval-BN already folded in)
    # w2_ref          : (D, 2D)   b2_ref: (D, 1)
    w1x = w1x_ref[...]
    w1g = w1g_ref[...]
    b1 = b1_ref[...]
    w2 = w2_ref[...]
    b2 = b2_ref[...]

    bt = desc_ref.shape[0]

    def body(b, carry):
        xf = desc_ref[b]                                          # (D, N) input dtype
        # Exact global max over the point (lane) axis, before any downcast.
        # Padded lanes (if any) hold -inf and never win.
        g = jnp.max(xf, axis=-1, keepdims=True)                   # (D, 1)
        x = xf.astype(w1x.dtype)                                  # per-tile cast in VMEM

        # Rank-1 "gloab" branch; layer-1 bias folded in so the (2D, N)
        # activation below gets a single broadcast add.
        gb = jnp.dot(w1g, g.astype(w1g.dtype),
                     preferred_element_type=jnp.float32) + b1     # (2D, 1) f32

        # Layer 1: 1x1 conv (BN folded into w1x/w1g/b1) + ReLU.
        h = jnp.dot(w1x, x, preferred_element_type=jnp.float32)   # (2D, N) f32
        h = jnp.maximum(h + gb, 0.0)

        # Layer 2: 1x1 conv + (zero-init) bias.
        y = jnp.dot(w2, h.astype(w2.dtype),
                    preferred_element_type=jnp.float32)           # (D, N) f32
        out_ref[b] = (y + b2).astype(out_ref.dtype)
        return carry

    # fori_loop (not a static Python loop) bounds per-iteration live ranges when
    # batch_tile is large; a small unroll keeps scheduler visibility.
    lax.fori_loop(0, bt, body, 0, unroll=min(bt, 4))


def prepare_params(raw, *, eps=1e-5, compute_dtype=jnp.float32):
    """Fold eval-mode BN into conv1 and split W1 by the torch cat order."""
    w1, b1 = raw["w1"], raw["b1"]            # (2D, 2D) as (C_out, C_in), (2D,)
    w2, b2 = raw["w2"], raw["b2"]            # (D, 2D), (D,)
    D2 = w1.shape[0]
    D = D2 // 2

    bn_scale = raw["gamma"] / jnp.sqrt(raw["rvar"] + eps)          # (2D,)
    bn_shift = raw["beta"] - raw["rmean"] * bn_scale
    w1f = w1 * bn_scale[:, None]                                   # scale output rows
    b1f = b1 * bn_scale + bn_shift

    w1x = w1f[:, :D]      # multiplies desc      (torch cat order: [desc, gloab])
    w1g = w1f[:, D:]      # multiplies the pooled global feature

    return (w1x.astype(compute_dtype),
            w1g.astype(compute_dtype),
            b1f.reshape(D2, 1).astype(jnp.float32),
            w2.astype(compute_dtype),
            b2.reshape(D, 1).astype(jnp.float32))


def _pick_batch_tile(B, D, N_pad, in_bytes, out_bytes, budget_bytes):
    """Largest divisor of B whose double-buffered in+out tiles fit the budget,
    capped at B//2 so the grid has >= 2 steps (keeps both v7x TCs busy)."""
    per_b = D * N_pad * 2 * (in_bytes + out_bytes)   # 2x = double buffering
    bt_cap = max(1, int(budget_bytes) // max(1, per_b))
    if B >= 2:
        bt_cap = min(bt_cap, B // 2)
    bt_cap = max(1, min(bt_cap, B))
    bt = 1
    for cand in range(1, bt_cap + 1):
        if B % cand == 0:
            bt = cand
    return bt


def pointnet_descriptor_encoder(desc_bdn, raw_params, *, eps=1e-5,
                                batch_tile=None,
                                compute_dtype=jnp.float32,
                                out_dtype=None,
                                vmem_tile_budget_bytes=4 << 20):
    """desc_bdn: (B, D, N) (PyTorch layout).  Returns (B, D, N) in out_dtype.

    compute_dtype=jnp.bfloat16 is recommended on v6e/v7x (f32 accumulation is
    kept via preferred_element_type); default f32 for bit-tight checks.
    The wrapper never casts the full input in HBM - casts happen per-tile in VMEM.
    """
    B, D, N = desc_bdn.shape
    D2 = 2 * D
    if out_dtype is None:
        out_dtype = desc_bdn.dtype

    # Lane-dense N: pad the point axis to a multiple of 128 with -inf so the
    # global max is unaffected; padded output columns are sliced off below.
    N_pad = ((N + 127) // 128) * 128
    desc_in = desc_bdn
    if N_pad != N:
        desc_in = jnp.pad(desc_bdn, ((0, 0), (0, 0), (0, N_pad - N)),
                          constant_values=-jnp.inf)

    in_bytes = desc_in.dtype.itemsize
    out_bytes = jnp.dtype(out_dtype).itemsize
    if batch_tile is None:
        batch_tile = _pick_batch_tile(B, D, N_pad, in_bytes, out_bytes,
                                      vmem_tile_budget_bytes)
    assert B % batch_tile == 0, "batch_tile must divide B"

    w1x, w1g, b1, w2, b2 = prepare_params(
        raw_params, eps=eps, compute_dtype=compute_dtype)

    # VMEM limit sized from the actual footprint (double-buffered tiles + weights),
    # clamped so it is valid on every generation (v5e 16 MiB default .. v7x 64 MiB).
    weight_bytes = ((w1x.size + w1g.size + w2.size) * jnp.dtype(compute_dtype).itemsize
                    + (b1.size + b2.size) * 4)
    tile_elems = batch_tile * D * N_pad
    needed = (2 * tile_elems * in_bytes + 2 * tile_elems * out_bytes
              + 2 * weight_bytes + (2 << 20))
    vmem_limit = int(min(max(needed, 16 << 20), 32 << 20))

    grid = (B // batch_tile,)
    out = pl.pallas_call(
        _encoder_kernel,
        out_shape=jax.ShapeDtypeStruct((B, D, N_pad), out_dtype),
        grid_spec=pltpu.PrefetchScalarGridSpec(
            num_scalar_prefetch=0,
            grid=grid,
            in_specs=[
                pl.BlockSpec((batch_tile, D, N_pad), lambda i: (i, 0, 0)),  # desc tile
                pl.BlockSpec((D2, D), lambda i: (0, 0)),                    # W1_x (BN-folded)
                pl.BlockSpec((D2, D), lambda i: (0, 0)),                    # W1_g (BN-folded)
                pl.BlockSpec((D2, 1), lambda i: (0, 0)),                    # b1 (BN-folded)
                pl.BlockSpec((D, D2), lambda i: (0, 0)),                    # W2
                pl.BlockSpec((D, 1), lambda i: (0, 0)),                     # b2
            ],
            out_specs=pl.BlockSpec((batch_tile, D, N_pad), lambda i: (i, 0, 0)),
        ),
        compiler_params=pltpu.CompilerParams(
            dimension_semantics=("parallel",),
            vmem_limit_bytes=vmem_limit),
    )(desc_in, w1x, w1g, b1, w2, b2)

    if N_pad != N:
        out = out[:, :, :N]
    return out


def init_raw_params(key, feature_dim):
    """Deterministic synthetic parameters matching the module's __init__ shapes."""
    D, D2 = feature_dim, 2 * feature_dim
    k = jax.random.split(key, 6)
    # Conv1d(2D, 2D, k=1): torch weight (2D, 2D, 1) -> stored as (C_out, C_in)
    w1 = jax.random.normal(k[0], (D2, D2), jnp.float32) * 0.05
    b1 = jax.random.normal(k[1], (D2,), jnp.float32) * 0.05
    # BatchNorm1d(2D), eval mode
    gamma = 1.0 + 0.1 * jax.random.normal(k[2], (D2,), jnp.float32)
    beta = 0.1 * jax.random.normal(k[3], (D2,), jnp.float32)
    rmean = 0.1 * jax.random.normal(k[4], (D2,), jnp.float32)
    rvar = jnp.abs(1.0 + 0.1 * jax.random.normal(k[5], (D2,), jnp.float32))
    # Conv1d(2D, D, k=1); nn.init.constant_(bias, 0.0)
    w2 = jax.random.normal(jax.random.fold_in(key, 7), (D, D2), jnp.float32) * 0.05
    b2 = jnp.zeros((D,), jnp.float32)
    return dict(w1=w1, b1=b1, gamma=gamma, beta=beta, rmean=rmean, rvar=rvar,
                w2=w2, b2=b2)


def reference_forward(desc, raw, eps=1e-5):
    """Pure-JAX reference mirroring the PyTorch forward (eval-mode BN), (B, D, N)."""
    g = jnp.max(desc, axis=2, keepdims=True)                       # (B, D, 1)
    x = jnp.concatenate([desc, jnp.broadcast_to(g, desc.shape)], axis=1)  # (B, 2D, N)
    h = jnp.einsum('oc,bcn->bon', raw["w1"], x) + raw["b1"][None, :, None]
    scale = raw["gamma"] / jnp.sqrt(raw["rvar"] + eps)
    h = scale[None, :, None] * (h - raw["rmean"][None, :, None]) + raw["beta"][None, :, None]
    h = jnp.maximum(h, 0.0)
    y = jnp.einsum('oc,bcn->bon', raw["w2"], h) + raw["b2"][None, :, None]
    return y


if __name__ == "__main__":
    feature_dim = 32   # D
    B, N = 8, 200      # batch, number of keypoints (N not a multiple of 128 on
                       # purpose: exercises the lane-dense -inf padding path)
    key = jax.random.PRNGKey(0)
    k_in, k_par = jax.random.split(key)

    desc = jax.random.normal(k_in, (B, feature_dim, N), jnp.float32)  # PyTorch (B, D, N)
    raw_params = init_raw_params(k_par, feature_dim)

    out = pointnet_descriptor_encoder(desc, raw_params)   # auto batch_tile, grid >= 2
    out = jax.block_until_ready(out)

    ref = reference_forward(desc, raw_params)
    assert out.shape == (B, feature_dim, N)
    assert jnp.allclose(out, ref, atol=1e-4, rtol=1e-4), "mismatch vs reference"

    print("KERNEL_OK")
</pallas_src>

<mosaic_0001>
module attributes {stable_mosaic.version = 11 : i64} {
  func.func @_encoder_kernel(%arg0: i32, %arg1: memref<4x32x256xf32, #tpu.memory_space<vmem>>, %arg2: memref<64x32xf32, #tpu.memory_space<vmem>>, %arg3: memref<64x32xf32, #tpu.memory_space<vmem>>, %arg4: memref<64x1xf32, #tpu.memory_space<vmem>>, %arg5: memref<32x64xf32, #tpu.memory_space<vmem>>, %arg6: memref<32x1xf32, #tpu.memory_space<vmem>>, %arg7: memref<4x32x256xf32, #tpu.memory_space<vmem>>) attributes {dimension_semantics = [#tpu.dimension_semantics<parallel>], iteration_bounds = array<i64: 2>, scalar_prefetch = 0 : i64, scratch_operands = 0 : i64, tpu.core_type = #tpu.core_type<tc>, window_params = [{transform_indices = @transform_0, window_bounds = array<i64: 4, 32, 256>}, {pipeline_mode = #tpu.pipeline_mode<synchronous>, transform_indices = @transform_1, window_bounds = array<i64: 64, 32>}, {pipeline_mode = #tpu.pipeline_mode<synchronous>, transform_indices = @transform_2, window_bounds = array<i64: 64, 32>}, {pipeline_mode = #tpu.pipeline_mode<synchronous>, transform_indices = @transform_3, window_bounds = array<i64: 64, 1>}, {pipeline_mode = #tpu.pipeline_mode<synchronous>, transform_indices = @transform_4, window_bounds = array<i64: 32, 64>}, {pipeline_mode = #tpu.pipeline_mode<synchronous>, transform_indices = @transform_5, window_bounds = array<i64: 32, 1>}, {transform_indices = @transform_6, window_bounds = array<i64: 4, 32, 256>}]} {
    %c0 = arith.constant 0 : index
    %c0_0 = arith.constant 0 : index
    %0 = vector.load %arg2[%c0, %c0_0] : memref<64x32xf32, #tpu.memory_space<vmem>>, vector<64x32xf32>
    %c0_1 = arith.constant 0 : index
    %c0_2 = arith.constant 0 : index
    %1 = vector.load %arg3[%c0_1, %c0_2] : memref<64x32xf32, #tpu.memory_space<vmem>>, vector<64x32xf32>
    %c0_3 = arith.constant 0 : index
    %c0_4 = arith.constant 0 : index
    %2 = vector.load %arg4[%c0_3, %c0_4] : memref<64x1xf32, #tpu.memory_space<vmem>>, vector<64x1xf32>
    %c0_5 = arith.constant 0 : index
    %c0_6 = arith.constant 0 : index
    %3 = vector.load %arg5[%c0_5, %c0_6] : memref<32x64xf32, #tpu.memory_space<vmem>>, vector<32x64xf32>
    %c0_7 = arith.constant 0 : index
    %c0_8 = arith.constant 0 : index
    %4 = vector.load %arg6[%c0_7, %c0_8] : memref<32x1xf32, #tpu.memory_space<vmem>>, vector<32x1xf32>
    %c0_i32 = arith.constant 0 : i32
    %5 = arith.index_cast %c0_i32 : i32 to index
    %c0_9 = arith.constant 0 : index
    %c0_10 = arith.constant 0 : index
    %6 = vector.load %arg1[%5, %c0_9, %c0_10] : memref<4x32x256xf32, #tpu.memory_space<vmem>>, vector<1x32x256xf32>
    %7 = vector.shape_cast %6 : vector<1x32x256xf32> to vector<32x256xf32>
    %cst = arith.constant dense<0xFF800000> : vector<32xf32>
    %8 = vector.multi_reduction <maximumf>, %7, %cst [1] : vector<32x256xf32> to vector<32xf32>
    %9 = vector.shape_cast %8 : vector<32xf32> to vector<32x1xf32>
    %cst_11 = arith.constant dense<0.000000e+00> : vector<64x1xf32>
    %10 = tpu.matmul %1, %9, %cst_11 {dimension_numbers = #tpu.dot_dimension_numbers<[1], [0], [0], [1], [0, 0, 1, 1], [], []>} : vector<64x32xf32>, vector<32x1xf32>, vector<64x1xf32> -> vector<64x1xf32>
    %11 = arith.addf %10, %2 : vector<64x1xf32>
    %cst_12 = arith.constant dense<0.000000e+00> : vector<64x256xf32>
    %12 = tpu.matmul %0, %7, %cst_12 {dimension_numbers = #tpu.dot_dimension_numbers<[1], [0], [0], [1], [0, 0, 1, 1], [], []>} : vector<64x32xf32>, vector<32x256xf32>, vector<64x256xf32> -> vector<64x256xf32>
    %13 = vector.broadcast %11 : vector<64x1xf32> to vector<64x256xf32>
    %14 = arith.addf %12, %13 : vector<64x256xf32>
    %cst_13 = arith.constant 0.000000e+00 : f32
    %15 = vector.broadcast %cst_13 : f32 to vector<64x256xf32>
    %16 = arith.maximumf %14, %15 : vector<64x256xf32>
    %cst_14 = arith.constant dense<0.000000e+00> : vector<32x256xf32>
    %17 = tpu.matmul %3, %16, %cst_14 {dimension_numbers = #tpu.dot_dimension_numbers<[1], [0], [0], [1], [0, 0, 1, 1], [], []>} : vector<32x64xf32>, vector<64x256xf32>, vector<32x256xf32> -> vector<32x256xf32>
    %18 = vector.broadcast %4 : vector<32x1xf32> to vector<32x256xf32>
    %19 = arith.addf %17, %18 : vector<32x256xf32>
    %20 = arith.index_cast %c0_i32 : i32 to index
    %c0_15 = arith.constant 0 : index
    %c0_16 = arith.constant 0 : index
    %21 = vector.load %arg7[%20, %c0_15, %c0_16] : memref<4x32x256xf32, #tpu.memory_space<vmem>>, vector<1x32x256xf32>
    %22 = vector.shape_cast %21 : vector<1x32x256xf32> to vector<32x256xf32>
    %23 = vector.shape_cast %19 : vector<32x256xf32> to vector<1x32x256xf32>
    tpu.vector_store %arg7[%20, %c0_15, %c0_16], %23 {strides = array<i32>} : memref<4x32x256xf32, #tpu.memory_space<vmem>>, vector<1x32x256xf32>,
    %c1_i32 = arith.constant 1 : i32
    %24 = arith.index_cast %c1_i32 : i32 to index
    %c0_17 = arith.constant 0 : index
    %c0_18 = arith.constant 0 : index
    %25 = vector.load %arg1[%24, %c0_17, %c0_18] : memref<4x32x256xf32, #tpu.memory_space<vmem>>, vector<1x32x256xf32>
    %26 = vector.shape_cast %25 : vector<1x32x256xf32> to vector<32x256xf32>
    %cst_19 = arith.constant dense<0xFF800000> : vector<32xf32>
    %27 = vector.multi_reduction <maximumf>, %26, %cst_19 [1] : vector<32x256xf32> to vector<32xf32>
    %28 = vector.shape_cast %27 : vector<32xf32> to vector<32x1xf32>
    %cst_20 = arith.constant dense<0.000000e+00> : vector<64x1xf32>
    %29 = tpu.matmul %1, %28, %cst_20 {dimension_numbers = #tpu.dot_dimension_numbers<[1], [0], [0], [1], [0, 0, 1, 1], [], []>} : vector<64x32xf32>, vector<32x1xf32>, vector<64x1xf32> -> vector<64x1xf32>
    %30 = arith.addf %29, %2 : vector<64x1xf32>
    %cst_21 = arith.constant dense<0.000000e+00> : vector<64x256xf32>
    %31 = tpu.matmul %0, %26, %cst_21 {dimension_numbers = #tpu.dot_dimension_numbers<[1], [0], [0], [1], [0, 0, 1, 1], [], []>} : vector<64x32xf32>, vector<32x256xf32>, vector<64x256xf32> -> vector<64x256xf32>
    %32 = vector.broadcast %30 : vector<64x1xf32> to vector<64x256xf32>
    %33 = arith.addf %31, %32 : vector<64x256xf32>
    %cst_22 = arith.constant 0.000000e+00 : f32
    %34 = vector.broadcast %cst_22 : f32 to vector<64x256xf32>
    %35 = arith.maximumf %33, %34 : vector<64x256xf32>
    %cst_23 = arith.constant dense<0.000000e+00> : vector<32x256xf32>
    %36 = tpu.matmul %3, %35, %cst_23 {dimension_numbers = #tpu.dot_dimension_numbers<[1], [0], [0], [1], [0, 0, 1, 1], [], []>} : vector<32x64xf32>, vector<64x256xf32>, vector<32x256xf32> -> vector<32x256xf32>
    %37 = vector.broadcast %4 : vector<32x1xf32> to vector<32x256xf32>
    %38 = arith.addf %36, %37 : vector<32x256xf32>
    %39 = arith.index_cast %c1_i32 : i32 to index
    %c0_24 = arith.constant 0 : index
    %c0_25 = arith.constant 0 : index
    %40 = vector.load %arg7[%39, %c0_24, %c0_25] : memref<4x32x256xf32, #tpu.memory_space<vmem>>, vector<1x32x256xf32>
    %41 = vector.shape_cast %40 : vector<1x32x256xf32> to vector<32x256xf32>
    %42 = vector.shape_cast %38 : vector<32x256xf32> to vector<1x32x256xf32>
    tpu.vector_store %arg7[%39, %c0_24, %c0_25], %42 {strides = array<i32>} : memref<4x32x256xf32, #tpu.memory_space<vmem>>, vector<1x32x256xf32>,
    %c2_i32 = arith.constant 2 : i32
    %43 = arith.index_cast %c2_i32 : i32 to index
    %c0_26 = arith.constant 0 : index
    %c0_27 = arith.constant 0 : index
    %44 = vector.load %arg1[%43, %c0_26, %c0_27] : memref<4x32x256xf32, #tpu.memory_space<vmem>>, vector<1x32x256xf32>
    %45 = vector.shape_cast %44 : vector<1x32x256xf32> to vector<32x256xf32>
    %cst_28 = arith.constant dense<0xFF800000> : vector<32xf32>
    %46 = vector.multi_reduction <maximumf>, %45, %cst_28 [1] : vector<32x256xf32> to vector<32xf32>
    %47 = vector.shape_cast %46 : vector<32xf32> to vector<32x1xf32>
    %cst_29 = arith.constant dense<0.000000e+00> : vector<64x1xf32>
    %48 = tpu.matmul %1, %47, %cst_29 {dimension_numbers = #tpu.dot_dimension_numbers<[1], [0], [0], [1], [0, 0, 1, 1], [], []>} : vector<64x32xf32>, vector<32x1xf32>, vector<64x1xf32> -> vector<64x1xf32>
    %49 = arith.addf %48, %2 : vector<64x1xf32>
    %cst_30 = arith.constant dense<0.000000e+00> : vector<64x256xf32>
    %50 = tpu.matmul %0, %45, %cst_30 {dimension_numbers = #tpu.dot_dimension_numbers<[1], [0], [0], [1], [0, 0, 1, 1], [], []>} : vector<64x32xf32>, vector<32x256xf32>, vector<64x256xf32> -> vector<64x256xf32>
    %51 = vector.broadcast %49 : vector<64x1xf32> to vector<64x256xf32>
    %52 = arith.addf %50, %51 : vector<64x256xf32>
    %cst_31 = arith.constant 0.000000e+00 : f32
    %53 = vector.broadcast %cst_31 : f32 to vector<64x256xf32>
    %54 = arith.maximumf %52, %53 : vector<64x256xf32>
    %cst_32 = arith.constant dense<0.000000e+00> : vector<32x256xf32>
    %55 = tpu.matmul %3, %54, %cst_32 {dimension_numbers = #tpu.dot_dimension_numbers<[1], [0], [0], [1], [0, 0, 1, 1], [], []>} : vector<32x64xf32>, vector<64x256xf32>, vector<32x256xf32> -> vector<32x256xf32>
    %56 = vector.broadcast %4 : vector<32x1xf32> to vector<32x256xf32>
    %57 = arith.addf %55, %56 : vector<32x256xf32>
    %58 = arith.index_cast %c2_i32 : i32 to index
    %c0_33 = arith.constant 0 : index
    %c0_34 = arith.constant 0 : index
    %59 = vector.load %arg7[%58, %c0_33, %c0_34] : memref<4x32x256xf32, #tpu.memory_space<vmem>>, vector<1x32x256xf32>
    %60 = vector.shape_cast %59 : vector<1x32x256xf32> to vector<32x256xf32>
    %61 = vector.shape_cast %57 : vector<32x256xf32> to vector<1x32x256xf32>
    tpu.vector_store %arg7[%58, %c0_33, %c0_34], %61 {strides = array<i32>} : memref<4x32x256xf32, #tpu.memory_space<vmem>>, vector<1x32x256xf32>,
    %c3_i32 = arith.constant 3 : i32
    %62 = arith.index_cast %c3_i32 : i32 to index
    %c0_35 = arith.constant 0 : index
    %c0_36 = arith.constant 0 : index
    %63 = vector.load %arg1[%62, %c0_35, %c0_36] : memref<4x32x256xf32, #tpu.memory_space<vmem>>, vector<1x32x256xf32>
    %64 = vector.shape_cast %63 : vector<1x32x256xf32> to vector<32x256xf32>
    %cst_37 = arith.constant dense<0xFF800000> : vector<32xf32>
    %65 = vector.multi_reduction <maximumf>, %64, %cst_37 [1] : vector<32x256xf32> to vector<32xf32>
    %66 = vector.shape_cast %65 : vector<32xf32> to vector<32x1xf32>
    %cst_38 = arith.constant dense<0.000000e+00> : vector<64x1xf32>
    %67 = tpu.matmul %1, %66, %cst_38 {dimension_numbers = #tpu.dot_dimension_numbers<[1], [0], [0], [1], [0, 0, 1, 1], [], []>} : vector<64x32xf32>, vector<32x1xf32>, vector<64x1xf32> -> vector<64x1xf32>
    %68 = arith.addf %67, %2 : vector<64x1xf32>
    %cst_39 = arith.constant dense<0.000000e+00> : vector<64x256xf32>
    %69 = tpu.matmul %0, %64, %cst_39 {dimension_numbers = #tpu.dot_dimension_numbers<[1], [0], [0], [1], [0, 0, 1, 1], [], []>} : vector<64x32xf32>, vector<32x256xf32>, vector<64x256xf32> -> vector<64x256xf32>
    %70 = vector.broadcast %68 : vector<64x1xf32> to vector<64x256xf32>
    %71 = arith.addf %69, %70 : vector<64x256xf32>
    %cst_40 = arith.constant 0.000000e+00 : f32
    %72 = vector.broadcast %cst_40 : f32 to vector<64x256xf32>
    %73 = arith.maximumf %71, %72 : vector<64x256xf32>
    %cst_41 = arith.constant dense<0.000000e+00> : vector<32x256xf32>
    %74 = tpu.matmul %3, %73, %cst_41 {dimension_numbers = #tpu.dot_dimension_numbers<[1], [0], [0], [1], [0, 0, 1, 1], [], []>} : vector<32x64xf32>, vector<64x256xf32>, vector<32x256xf32> -> vector<32x256xf32>
    %75 = vector.broadcast %4 : vector<32x1xf32> to vector<32x256xf32>
    %76 = arith.addf %74, %75 : vector<32x256xf32>
    %77 = arith.index_cast %c3_i32 : i32 to index
    %c0_42 = arith.constant 0 : index
    %c0_43 = arith.constant 0 : index
    %78 = vector.load %arg7[%77, %c0_42, %c0_43] : memref<4x32x256xf32, #tpu.memory_space<vmem>>, vector<1x32x256xf32>
    %79 = vector.shape_cast %78 : vector<1x32x256xf32> to vector<32x256xf32>
    %80 = vector.shape_cast %76 : vector<32x256xf32> to vector<1x32x256xf32>
    tpu.vector_store %arg7[%77, %c0_42, %c0_43], %80 {strides = array<i32>} : memref<4x32x256xf32, #tpu.memory_space<vmem>>, vector<1x32x256xf32>,
    %c4_i32 = arith.constant 4 : i32
    return
  }
  func.func @transform_0(%arg0: i32) -> (i32, i32, i32) {
    %c0_i32 = arith.constant 0 : i32
    %c0_i32_0 = arith.constant 0 : i32
    %c0_i32_1 = arith.constant 0 : i32
    return %arg0, %c0_i32, %c0_i32_0 : i32, i32, i32
  }
  func.func @transform_1(%arg0: i32) -> (i32, i32) {
    %c0_i32 = arith.constant 0 : i32
    %c0_i32_0 = arith.constant 0 : i32
    %c0_i32_1 = arith.constant 0 : i32
    return %c0_i32, %c0_i32_0 : i32, i32
  }
  func.func @transform_2(%arg0: i32) -> (i32, i32) {
    %c0_i32 = arith.constant 0 : i32
    %c0_i32_0 = arith.constant 0 : i32
    %c0_i32_1 = arith.constant 0 : i32
    return %c0_i32, %c0_i32_0 : i32, i32
  }
  func.func @transform_3(%arg0: i32) -> (i32, i32) {
    %c0_i32 = arith.constant 0 : i32
    %c0_i32_0 = arith.constant 0 : i32
    %c0_i32_1 = arith.constant 0 : i32
    return %c0_i32, %c0_i32_0 : i32, i32
  }
  func.func @transform_4(%arg0: i32) -> (i32, i32) {
    %c0_i32 = arith.constant 0 : i32
    %c0_i32_0 = arith.constant 0 : i32
    %c0_i32_1 = arith.constant 0 : i32
    return %c0_i32, %c0_i32_0 : i32, i32
  }
  func.func @transform_5(%arg0: i32) -> (i32, i32) {
    %c0_i32 = arith.constant 0 : i32
    %c0_i32_0 = arith.constant 0 : i32
    %c0_i32_1 = arith.constant 0 : i32
    return %c0_i32, %c0_i32_0 : i32, i32
  }
  func.func @transform_6(%arg0: i32) -> (i32, i32, i32) {
    %c0_i32 = arith.constant 0 : i32
    %c0_i32_0 = arith.constant 0 : i32
    %c0_i32_1 = arith.constant 0 : i32
    return %arg0, %c0_i32, %c0_i32_0 : i32, i32, i32
  }
}

</mosaic_0001>

<bundles_post_ra>
// kernel: tpu_custom_call.1
= control target key start
LH: loop header
LB: loop body
LE: loop exit
PB: predicated region body
PF: predicated region fallthrough
CT: control target
= control target key end

     0   :  { %11 = vsyncpa [#allocation3], 0  ;;  %s3554_s0 = inlined_call_operand.hbm [shape: f32[8,32,256], index: 0, kind: input, shape index: {}]   ;;  %s3555_s1 = inlined_call_operand.vmem [shape: f32[64,32], index: 1, kind: input, shape index: {}]   ;;  %s3556_s2 = inlined_call_operand.vmem [shape: f32[64,32], index: 2, kind: input, shape index: {}]   ;;  %s3557_s3 = inlined_call_operand.vmem [shape: f32[64,1], index: 3, kind: input, shape index: {}]   ;;  %s3558_s4 = inlined_call_operand.vmem [shape: f32[32,64], index: 4, kind: input, shape index: {}]   ;;  %s3559_s5 = inlined_call_operand.vmem [shape: f32[32,1], index: 5, kind: input, shape index: {}]   ;;  %s3560_s6 = inlined_call_operand.hbm [shape: f32[8,32,256], index: 6, kind: output, shape index: {}]  }
   0x1   :  { %13 = vsyncpa [#allocation3 + $0x1], 0 }
   0x2   :  { %14 = vsyncpa [#allocation4], 0 }
   0x3   :  { %16 = vsyncpa [#allocation4 + $0x1], 0  ;;  %s2656_s21 = smov 0   ;;  %s2658_s22 = smov 0  }
   0x4   :  { %s2660_s23 = smov 0   ;;  %s2662_s24 = smov 0  }
   0x5 LB: > { %s2677_s25 = sadd.s32 4294967295, %s2611_s24   ;;  %s2045_s26 = sadd.s32 4294967294, %s2611_s24   ;;  %s2611_s24 = sphi %s2662_s24, %s3609_s24   ;;  %s2607_s23 = sphi %s2660_s23, %s3608_s23   ;;  %s2603_s22 = sphi %s2658_s22, %s3607_s22   ;;  %s2599_s21 = sphi %s2656_s21, %s3606_s21  }
   0x6   : > { %s2681_s27 = sadd.s32 1, %s2611_s24   ;;  %s29_s28 = sadd.s32 1, %s2607_s23 }
   0x7   : > { %s26_s29 = ssub.s32 %s2611_s24, %s2681_s27  ;;  %p36_p0 = scmp.ne.s32.totalorder %s2607_s23, %s2603_s22 }
   0x8   : > { %p27_p1 = scmp.eq.s32.totalorder %s26_s29, 0  ;;  %p37_p2 = scmp.eq.s32.totalorder %s2611_s24, 0 }
   0x9   : > { %p42_p3 = scmp.ne.s32.totalorder %s2603_s22, %s2599_s21  ;;  %p43_p4 = scmp.eq.s32.totalorder %s2677_s25, 0 }
   0xa   : > { %s2693_s30 = scalar_select %p27_p1, %s2607_s23, %s29_s28  }
   0xb   : > { %p2695_p5 = por %p37_p2, %p36_p0  ;;  %p2699_p6 = por %p43_p4, %p42_p3 }
   0xc   : > { %p171_p7 = scmp.eq.s32.totalorder %s2677_s25, 1  ;;  %p177_p8 = scmp.eq.s32.totalorder %s2045_s26, 1 }
   0xd   : > { %p2461_p10 = scmp.lt.s32.totalorder %s2611_s24, 2  ;;  %s212_s11 = sand.u32 1, %s2607_s23  }
   0xe   : > { %p2706_p11 = por %p171_p7, %p36_p0  ;;  %p2710_p12 = por %p177_p8, %p42_p3 }
   0xf   : > { %s2190_s12 = sshll.u32 %s2611_s24, 12  ;;  %s2048_s13 = sshll.u32 %s212_s11, 8 }
  0x10   : > { %s3574_s9 = scalar_select %p2706_p11, 1, 0 }
  0x11   : > { %s3575_s10 = scalar_select %p2710_p12, 1, 0 }
  0x12   : > { %s2719_s16 = scalar_lea.hbm %s3554_s0, %s2190_s12  ;;  %s216_s17 = scalar_lea.vmem [#allocation2], %s2048_s13 }
  0x13   : > { %s224_s18 = sshll.u32 %s216_s17, 4  ;;  %p2723_p13 = pnand %p2461_p10, %p2695_p5  ;;  %s2727_s18 = int_to_ptr.vmem [resolvable:$true] %s224_s18 }
  0x14   : > { %s2729_s20 = scalar_lea.sflag [#allocation3], %s212_s11  ;;  %s2515_s26 = scalar_lea.hbm %s2719_s16, 4096 }
  0x15   : > { %p2516_p0 = scmp.ne.s32.totalorder %s2719_s16, %s2515_s26  ;;  %p2517_p1 = pneg %p2723_p13 }
  0x16   : > { %s2520_s7 = scalar_lea.hbm %s3554_s0, 8192  ;;  %p2521_p4 = scmp.lt.u32.totalorder %s2719_s16, %s3554_s0 }
  0x17   : > { %p2518_p2 = pnand %p2517_p1, %p2516_p0  ;;  %p2522_p5 = scmp.lt.u32.totalorder %s2520_s7, %s2515_s26 }
  0x18   : > { %p2524_p8 = scmp.lt.u32.totalorder %s2515_s26, %s2719_s16 }
  0x19   : > { %p2519_p3 = pneg %p2518_p2  ;;  %p2523_p7 = por %p2522_p5, %p2521_p4 }
  0x1b   : > { %p2525_p10 = por %p2524_p8, %p2523_p7 }
  0x1d   : > { %p2526_p9 = pnand %p2525_p10, %p2519_p3 }
  0x1f   : > { %2529 = shalt.err (!%p2526_p9)
}
  0x20   : > { %s2530_s11 = scalar_lea.vmem %s2727_s18, 4096  ;;  %s2613_s14 = smov [#allocation2]  }
  0x21   : > { %p2531_p0 = scmp.ne.s32.totalorder %s2727_s18, %s2530_s11  ;;  %s2535_s15 = sshll.u32 %s2613_s14, 4  ;;  %s2536_s15 = int_to_ptr.vmem [resolvable:$false] %s2535_s15 }
  0x22   : > { %s2537_s17 = scalar_lea.vmem %s2536_s15, 8192  ;;  %p2538_p11 = scmp.lt.s32.totalorder %s2727_s18, %s2536_s15 }
  0x23   : > { %p2533_p2 = pnand %p2531_p0, %p2517_p1  ;;  %p2539_p4 = scmp.lt.s32.totalorder %s2537_s17, %s2530_s11 }
  0x25   : > { %p2534_p12 = pneg %p2533_p2  ;;  %p2540_p5 = por %p2539_p4, %p2538_p11 }
  0x27   : > { %p2541_p7 = pnand %p2540_p5, %p2534_p12 }
  0x29   : > { %2544 = shalt.err (!%p2541_p7)
}
  0x2a   : > { %s2614_s26 = smov 256   ;;  %s2615_s28 = smov 16  }
  0x2b   : > { %2456 = dma.hbm_to_vmem [thread:$0]  (!%p2723_p13), %s2719_s16, 4096, %s2727_s18, %s2729_s20, %s2614_s26, %s2614_s26, %s2615_s28  }
  0x2c   : > { %p2052_p9 = scmp.ge.s32.totalorder %s2611_s24, 1  ;;  %p232_p1 = scmp.lt.s32.totalorder %s2611_s24, 3 }
  0x2e   : > { %p233_p3 = pnand %p2052_p9, %p232_p1 }
  0x30   : > { %236 = sbr.rel (%p233_p3) target bundleno = 2074 (0x81a), region = 44 }
  0x37   : > { %s2760_s29 = sand.u32 1, %s2603_s22  }
  0x38   : > { %s2053_s7 = sshll.u32 %s2760_s29, 8  ;;  %s239_s12 = scalar_lea.sflag [#allocation3], %s2760_s29 }
  0x39   : > { %s2766_s13 = scalar_lea.vmem [#allocation2], %s2053_s7 }
  0x3a   : > { %2590 = dma.done.wait (%p2699_p6), %s239_s12, 4096  }
  0x3b   : > { %2592 = vsyncadd (%p2699_p6), %s239_s12, 4294963200  ;;  %v309_v0 = vld [vmem:[%s2766_s13 + $0x20] sm:$0xff]  ;;  %v310_v1 = vld [vmem:[%s2766_s13 + $0x28] sm:$0xff]  ;;  %vm325_vm0 = vcmask 261120   ;;  %v3562_v16 = vmov 0.0   ;;  %v2617_v42 = vmov 0  }
  0x3c   : > { %v311_v2 = vld [vmem:[%s2766_s13 + $0x30] sm:$0xff]  ;;  %v312_v3 = vld [vmem:[%s2766_s13 + $0x38] sm:$0xff]  ;;  %v319_v4 = vmax.f32 %v309_v0, %v310_v1  ;;  %v305_v5 = vld [vmem:[%s2766_s13] sm:$0xff]  ;;  %583 = vmatprep.mubr.f32.mxu1 %v3562_v16  ;;  %2501 = vset.pattern.permute.xlu1 %v2617_v42  ;;  %vm668_vm1 = vcmask 523264   ;;  %s3414_s14 = scalar_lea.vmem [#allocation5], %s2053_s7  ;;  %s2192_s16 = sshll.u32 %s2677_s25, 12 }
  0x3d   : > { %v306_v6 = vld [vmem:[%s2766_s13 + $0x8] sm:$0xff]  ;;  %v307_v8 = vld [vmem:[%s2766_s13 + $0x10] sm:$0xff]  ;;  %v308_v9 = vld [vmem:[%s2766_s13 + $0x18] sm:$0xff]  ;;  %v322_v10 = vmax.f32 %v311_v2, %v312_v3  ;;  %v2333_v13 = vpack.c.bf16 %v312_v3, %v310_v1  ;;  %v2335_v18 = vpack.c.bf16 %v311_v2, %v309_v0  ;;  %2502 = vset.pattern.permute.xlu0 %v2617_v42  ;;  %s1972_s18 = sshll.u32 %s3414_s14, 4  ;;  %s3505_s11 = scalar_lea.hbm %s3560_s6, %s2192_s16  ;;  %s3507_s18 = int_to_ptr.vmem [resolvable:$true] %s1972_s18 }
  0x3e   : > { %v313_v7 = vmax.f32 %v305_v5, %v306_v6  ;;  %320 = vmax.xlane.f32.xlu1 %v319_v4  ;;  %v316_v11 = vmax.f32 %v307_v8, %v308_v9  ;;  %v2783_v12 = vld [vmem:[%s3556_s2] sm:$0xff]  ;;  %v2329_v14 = vpack.c.bf16 %v308_v9, %v306_v6  ;;  %v2331_v15 = vpack.c.bf16 %v307_v8, %v305_v5  ;;  %v2076_v19 = vld [vmem:[%s2766_s13 + $0x48] sm:$0xff]  ;;  %v2812_v23 = vld [vmem:[%s3555_s1 + $0x10] sm:$0xff]  ;;  %s1958_s25 = scalar_lea.sflag [#allocation4], %s2760_s29  ;;  %s2545_s7 = scalar_lea.vmem %s3507_s18, 4096 }
  0x3f   : > { %2249 = vmatprep.mubr.msk.f32.mxu0 %vm325_vm0, %v2783_v12  ;;  %v2789_v17 = vld [vmem:[%s2766_s13 + $0x40] sm:$0xff]  ;;  %v2804_v22 = vld [vmem:[%s3555_s1 + $0x8] sm:$0xff]  ;;  %v2820_v24 = vld [vmem:[%s3555_s1 + $0x18] sm:$0xff]  ;;  %p2546_p6 = scmp.ne.s32.totalorder %s3507_s18, %s2545_s7  ;;  %p3603_p11 = scmp.ne.s32.totalorder %s3574_s9, 0 }
  0x40   : > { %314 = vmax.xlane.f32.xlu0 %v313_v7  ;;  %2330 = vmatprep.subr.bf16.mxu1 %v2329_v14  ;;  %v787_v20 = vmax.f32 %v2789_v17, %v2076_v19  ;;  %v2796_v21 = vld [vmem:[%s3555_s1] sm:$0xff]  ;;  %v2836_v26 = vld [vmem:[%s3555_s1 + $0x28] sm:$0xff]  ;;  %v2844_v27 = vld [vmem:[%s3555_s1 + $0x30] sm:$0xff]  ;;  %s2618_s15 = smov [#allocation5]  }
  0x41   : > { %2332 = vmatpush1.bf16.msra.mxu1 %v2331_v15  ;;  %v2828_v25 = vld [vmem:[%s3555_s1 + $0x20] sm:$0xff]  ;;  %v2852_v28 = vld [vmem:[%s3555_s1 + $0x38] sm:$0xff]  ;;  %v2860_v35 = vld [vmem:[%s3556_s2 + $0x8] sm:$0xff]  ;;  %p2547_p12 = pnand %p2546_p6, %p3603_p11 }
  0x42   : > { %323 = vmax.xlane.f32.xlu1 %v322_v10  ;;  %2334 = vmatprep.subr.bf16.mxu1 %v2333_v13  ;;  %v2865_v36 = vld [vmem:[%s3556_s2 + $0x10] sm:$0xff]  ;;  %v2874_v37 = vld [vmem:[%s3556_s2 + $0x18] sm:$0xff]  ;;  %v2879_v38 = vld [vmem:[%s3556_s2 + $0x20] sm:$0xff] }
  0x43   : > { %v2888_v39 = vld [vmem:[%s3556_s2 + $0x28] sm:$0xff]  ;;  %v2893_v40 = vld [vmem:[%s3556_s2 + $0x30] sm:$0xff]  ;;  %v2902_v41 = vld [vmem:[%s3556_s2 + $0x38] sm:$0xff]  ;;  %p2548_p13 = pneg %p2547_p12 }
  0x44   : > { %317 = vmax.xlane.f32.xlu0 %v316_v11  ;;  %v2908_v43 = vld [vmem:[%s2766_s13 + $0x50] sm:$0xff]  ;;  %v2911_v44 = vld [vmem:[%s2766_s13 + $0x58] sm:$0xff]  ;;  %v2927_v51 = vld [vmem:[%s2766_s13 + $0x60] sm:$0xff] }
  0x45   : > { %2336 = vmatpush1.bf16.msra.mxu1 %v2335_v18  ;;  %v790_v45 = vmax.f32 %v2908_v43, %v2911_v44  ;;  %v2361_v46 = vpack.c.bf16 %v2911_v44, %v2076_v19  ;;  %v2363_v47 = vpack.c.bf16 %v2908_v43, %v2789_v17  ;;  %v2919_v48 = vld [vmem:[%s2766_s13 + $0x70] sm:$0xff]  ;;  %v2922_v49 = vld [vmem:[%s2766_s13 + $0x78] sm:$0xff]  ;;  %v2930_v52 = vld [vmem:[%s2766_s13 + $0x68] sm:$0xff] }
  0x46   : > { %788 = vmax.xlane.f32.xlu1 %v787_v20  ;;  %v796_v50 = vmax.f32 %v2919_v48, %v2922_v49  ;;  %v793_v53 = vmax.f32 %v2927_v51, %v2930_v52  ;;  %v2365_v54 = vpack.c.bf16 %v2922_v49, %v2930_v52  ;;  %v2367_v55 = vpack.c.bf16 %v2919_v48, %v2927_v51  ;;  %v2971_v59 = vld [vmem:[%s3557_s3 + $0x8] sm:$0xff]  ;;  %v2976_v60 = vld [vmem:[%s3557_s3] sm:$0xff]  ;;  %v2983_v1 = vld [vmem:[%s3557_s3 + $0x18] sm:$0xff] }
  0x47   : > { %2362 = vmatprep.subr.bf16.mxu1 %v2361_v46  ;;  %v2989_v9 = vld [vmem:[%s3557_s3 + $0x10] sm:$0xff]  ;;  %v2994_v11 = vld [vmem:[%s3557_s3 + $0x28] sm:$0xff] }
  0x48   : > { %2063 = vmatmul.mubr.msk.f32.vlgmr.msra.gmra.mrb[0].mxu1 %vm325_vm0, %v2796_v21  ;;  %3577 = vst [vmem:[#allocation8_spill] sm:$0xff] %v2994_v11 }
  0x49   : > { %589 = vmatprep.mubr.f32.mxu1 %v3562_v16  ;;  %2364 = vmatpush1.bf16.msra.mxu1 %v2363_v47 }
  0x4a   : > { %2366 = vmatprep.subr.bf16.mxu1 %v2365_v54 }
  0x4c   : > { %2064 = vmatmul.mubr.msk.f32.gmra.mrb[2].mxu1 %vm325_vm0, %v2804_v22 }
  0x4d   : > { %595 = vmatprep.mubr.f32.mxu1 %v3562_v16  ;;  %2368 = vmatpush1.bf16.msra.mxu1 %v2367_v55  ;;  %v3013_v55 = vld [vmem:[%s3557_s3 + $0x30] sm:$0xff] }
  0x4e   : > { %3580 = vst [vmem:[#allocation11_spill] sm:$0xff] %v3013_v55 }
  0x50   : > { %2065 = vmatmul.mubr.msk.f32.gmra.mrb[4].mxu1 %vm325_vm0, %v2812_v23 }
  0x51   : > { %601 = vmatprep.mubr.f32.mxu1 %v3562_v16 }
  0x54   : > { %2066 = vmatmul.mubr.msk.f32.gmra.mrb[6].mxu1 %vm325_vm0, %v2820_v24 }
  0x55   : > { %607 = vmatprep.mubr.f32.mxu1 %v3562_v16 }
  0x58   : > { %2067 = vmatmul.mubr.msk.f32.gmra.mrb[8].mxu1 %vm325_vm0, %v2828_v25 }
  0x59   : > { %613 = vmatprep.mubr.f32.mxu1 %v3562_v16 }
  0x5c   : > { %2068 = vmatmul.mubr.msk.f32.gmra.mrb[10].mxu1 %vm325_vm0, %v2836_v26 }
  0x5d   : > { %619 = vmatprep.mubr.f32.mxu1 %v3562_v16 }
  0x60   : > { %2069 = vmatmul.mubr.msk.f32.gmra.mrb[12].mxu1 %vm325_vm0, %v2844_v27 }
  0x61   : > { %625 = vmatprep.mubr.f32.mxu1 %v3562_v16 }
  0x64   : > { %2070 = vmatmul.mubr.msk.f32.gmra.mrb[14].mxu1 %vm325_vm0, %v2852_v28 }
  0x65   : > { %1008 = vmatprep.mubr.f32.mxu1 %v3562_v16 }
  0x68   : > { %2091 = vmatmul.mubr.msk.f32.vlgmr.msra.gmra.mrb[16].mxu1 %vm325_vm0, %v2796_v21 }
  0x69   : > { %1014 = vmatprep.mubr.f32.mxu1 %v3562_v16 }
  0x6c   : > { %2092 = vmatmul.mubr.msk.f32.gmra.mrb[18].mxu1 %vm325_vm0, %v2804_v22 }
  0x6d   : > { %1020 = vmatprep.mubr.f32.mxu1 %v3562_v16 }
  0x70   : > { %2093 = vmatmul.mubr.msk.f32.gmra.mrb[20].mxu1 %vm325_vm0, %v2812_v23 }
  0x71   : > { %1026 = vmatprep.mubr.f32.mxu1 %v3562_v16 }
  0x74   : > { %2094 = vmatmul.mubr.msk.f32.gmra.mrb[22].mxu1 %vm325_vm0, %v2820_v24 }
  0x75   : > { %1032 = vmatprep.mubr.f32.mxu1 %v3562_v16 }
  0x78   : > { %2095 = vmatmul.mubr.msk.f32.gmra.mrb[24].mxu1 %vm325_vm0, %v2828_v25 }
  0x79   : > { %1038 = vmatprep.mubr.f32.mxu1 %v3562_v16 }
  0x7c   : > { %2096 = vmatmul.mubr.msk.f32.gmra.mrb[26].mxu1 %vm325_vm0, %v2836_v26 }
  0x7d   : > { %1044 = vmatprep.mubr.f32.mxu1 %v3562_v16 }
  0x80   : > { %2097 = vmatmul.mubr.msk.f32.gmra.mrb[28].mxu1 %vm325_vm0, %v2844_v27 }
  0x81   : > { %1050 = vmatprep.mubr.f32.mxu1 %v3562_v16 }
  0x84   : > { %2098 = vmatmul.mubr.msk.f32.gmra.mrb[30].mxu1 %vm325_vm0, %v2852_v28 }
  0x85   : > { %1401 = vmatprep.mubr.f32.mxu1 %v3562_v16 }
  0xcb   : > { %v321_v29 = vpop.xlane.xlu1 %320 }
  0xcd   : > { %v315_v30 = vpop.xlane.xlu0 %314 }
  0xcf   : > { %v324_v31 = vpop.xlane.xlu1 %323 }
  0xd0   : > { %v2325_v34 = vpack.c.bf16 %v324_v31, %v321_v29  ;;  %v3001_v31 = vld [vmem:[%s3557_s3 + $0x20] sm:$0xff] }
  0xd1   : > { %v318_v32 = vpop.xlane.xlu0 %317  ;;  %3578 = vst [vmem:[#allocation9_spill] sm:$0xff] %v3001_v31 }
  0xd2   : > { %v2321_v33 = vpack.c.bf16 %v318_v32, %v315_v30 }
  0xd4   : > { %2322 = vmatprep.subr.bf16.mxu0 %v2321_v33 }
  0xd5   : > { %2324 = vmatpush3.bf16.msra.mxu0 %v2321_v33  ;;  %v3006_v33 = vld [vmem:[%s3557_s3 + $0x38] sm:$0xff] }
  0xd6   : > { %2326 = vmatprep.subr.bf16.mxu0 %v2325_v34  ;;  %3579 = vst [vmem:[#allocation10_spill] sm:$0xff] %v3006_v33 }
  0xd9   : > { %2328 = vmatpush3.bf16.msra.mxu0 %v2325_v34 }
  0xdc   : > { %2250 = vmatmul.mubr.msk.f32.vlgmr.msra.gmra.mrb[0].mxu0 %vm325_vm0, %v2860_v35 }
  0xdd   : > { %2252 = vmatprep.mubr.msk.f32.mxu0 %vm325_vm0, %v2865_v36 }
  0xe0   : > { %2253 = vmatmul.mubr.msk.f32.gmra.mrb[2].mxu0 %vm325_vm0, %v2874_v37 }
  0xe1   : > { %2255 = vmatprep.mubr.msk.f32.mxu0 %vm325_vm0, %v2879_v38 }
  0xe4   : > { %2256 = vmatmul.mubr.msk.f32.gmra.mrb[4].mxu0 %vm325_vm0, %v2888_v39 }
  0xe5   : > { %2258 = vmatprep.mubr.msk.f32.mxu0 %vm325_vm0, %v2893_v40 }
  0xe8   : > { %2259 = vmatmul.mubr.msk.f32.gmra.mrb[6].mxu0 %vm325_vm0, %v2902_v41 }
  0xe9   : > { %745 = vmatprep.mubr.f32.mxu0 %v3562_v16 }
 0x11b   : > { %v2938_v56 = vpop.f32.mrb[0].mxu1 }
 0x11c   : > { %v2940_v57 = vpop.f32.mrb[1].mxu1 }
 0x11f   : > { %v2942_v58 = vpop.f32.mrb[2].mxu1 }
 0x120   : > { %v593_v2 = vpop.f32.mrb[3].mxu1 }
 0x123   : > { %v597_v3 = vpop.f32.mrb[4].mxu1 }
 0x124   : > { %v599_v5 = vpop.f32.mrb[5].mxu1 }
 0x127   : > { %v603_v8 = vpop.f32.mrb[6].mxu1 }
 0x128   : > { %v605_v10 = vpop.f32.mrb[7].mxu1 }
 0x12b   : > { %v609_v18 = vpop.f32.mrb[8].mxu1 }
 0x12c   : > { %v611_v20 = vpop.f32.mrb[9].mxu1 }
 0x12f   : > { %v615_v30 = vpop.f32.mrb[10].mxu1 }
 0x130   : > { %v617_v32 = vpop.f32.mrb[11].mxu1 }
 0x133   : > { %v621_v46 = vpop.f32.mrb[12].mxu1 }
 0x134   : > { %v623_v47 = vpop.f32.mrb[13].mxu1 }
 0x137   : > { %v627_v54 = vpop.f32.mrb[14].mxu1 }
 0x1af   : > { %v2251_v61 = vpop.f32.mrb[0].mxu0 }
 0x1b0   : > { %v422_v62 = vadd.f32 %v2251_v61, %v2971_v59  ;;  %v416_v63 = vpop.f32.mrb[1].mxu0  ;;  %v629_v61 = vpop.f32.mrb[15].mxu1 }
 0x1b1   : > { %v417_v0 = vadd.f32 %v416_v63, %v2976_v60  ;;  %v3026_v63 = vld [vmem:[%s2766_s13 + $0x90] sm:$0xff] }
 0x1b2   : > { %462 = vperm.xlu1 %2501, %v422_v62  }
 0x1b3   : > { %v2254_v4 = vpop.f32.mrb[2].mxu0  ;;  %457 = vperm.xlu0 %2502, %v417_v0   ;;  %v3029_v0 = vld [vmem:[%s2766_s13 + $0x98] sm:$0xff] }
 0x1b4   : > { %v432_v6 = vadd.f32 %v2254_v4, %v2983_v1  ;;  %v426_v7 = vpop.f32.mrb[3].mxu0  ;;  %v1183_v4 = vmax.f32 %v3026_v63, %v3029_v0 }
 0x1b5   : > { %v427_v14 = vadd.f32 %v426_v7, %v2989_v9 }
 0x1b6   : > { %472 = vperm.xlu1 %2501, %v432_v6   ;;  %v3033_v6 = vpop.xlane.xlu1 %788 }
 0x1b7   : > { %v2257_v13 = vpop.f32.mrb[4].mxu0 }
 0x1b8   : > { %v436_v15 = vpop.f32.mrb[5].mxu0  ;;  %v442_v17 = vadd.f32 %v2257_v13, %v2994_v11 }
 0x1b9   : > { %v437_v34 = vadd.f32 %v436_v15, %v3001_v31 }
 0x1ba   : > { %467 = vperm.xlu1 %2501, %v427_v14  }
 0x1bb   : > { %v2260_v19 = vpop.f32.mrb[6].mxu0 }
 0x1bc   : > { %v446_v29 = vpop.f32.mrb[7].mxu0  ;;  %v452_v42 = vadd.f32 %v2260_v19, %v3006_v33 }
 0x1bd   : > { %v447_v62 = vadd.f32 %v446_v29, %v3013_v55 }
 0x1be   : > { %482 = vperm.xlu1 %2501, %v442_v17  }
 0x1c2   : > { %477 = vperm.xlu1 %2501, %v437_v34  }
 0x1c6   : > { %492 = vperm.xlu1 %2501, %v452_v42  }
 0x1ca   : > { %487 = vperm.xlu1 %2501, %v447_v62  }
 0x1d2   : > { %791 = vmax.xlane.f32.xlu0 %v790_v45 }
 0x1d6   : > { %794 = vmax.xlane.f32.xlu0 %v793_v53 }
 0x1da   : > { %1184 = vmax.xlane.f32.xlu0 %v1183_v4 }
 0x1ee   : > { %797 = vmax.xlane.f32.xlu1 %v796_v50 }
 0x231   : > { %v463_v43 = vpop.permute.xlu1 %462 }
 0x232   : > { %v592_v44 = vadd.f32 %v2942_v58, %v463_v43  ;;  %v594_v45 = vadd.f32 %v593_v2, %v463_v43  ;;  %v458_v51 = vpop.permute.xlu0 %457 }
 0x233   : > { %v586_v52 = vadd.f32 %v2938_v56, %v458_v51  ;;  %v588_v48 = vadd.f32 %v2940_v57, %v458_v51 }
 0x234   : > { %v634_v49 = vmax.f32 %v592_v44, 0.0  ;;  %v635_v50 = vmax.f32 %v594_v45, 0.0 }
 0x235   : > { %v632_v53 = vmax.f32 %v586_v52, 0.0  ;;  %v633_v7 = vmax.f32 %v588_v48, 0.0  ;;  %v473_v13 = vpop.permute.xlu1 %472 }
 0x236   : > { %v604_v17 = vadd.f32 %v603_v8, %v473_v13  ;;  %v606_v19 = vadd.f32 %v605_v10, %v473_v13 }
 0x237   : > { %v2339_v14 = vpack.c.bf16 %v634_v49, %v632_v53  ;;  %v2337_v15 = vpack.c.bf16 %v635_v50, %v633_v7 }
 0x238   : > { %v638_v58 = vmax.f32 %v604_v17, 0.0  ;;  %v639_v2 = vmax.f32 %v606_v19, 0.0 }
 0x239   : > { %v468_v29 = vpop.permute.xlu1 %467  ;;  %2338 = vmatprep.subr.bf16.mxu0 %v2337_v15 }
 0x23a   : > { %v598_v34 = vadd.f32 %v597_v3, %v468_v29  ;;  %v600_v42 = vadd.f32 %v599_v5, %v468_v29  ;;  %2340 = vmatpush1.bf16.msra.mxu0 %v2339_v14 }
 0x23c   : > { %v636_v62 = vmax.f32 %v598_v34, 0.0  ;;  %v637_v56 = vmax.f32 %v600_v42, 0.0  ;;  %v3041_v34 = vld [vmem:[%s3558_s4] sm:$0xff] }
 0x23d   : > { %v483_v4 = vpop.permute.xlu1 %482 }
 0x23e   : > { %v2343_v57 = vpack.c.bf16 %v638_v58, %v636_v62  ;;  %v2341_v43 = vpack.c.bf16 %v639_v2, %v637_v56  ;;  %v616_v44 = vadd.f32 %v615_v30, %v483_v4  ;;  %v618_v45 = vadd.f32 %v617_v32, %v483_v4  ;;  %v2112_v56 = vld [vmem:[%s2766_s13 + $0x88] sm:$0xff] }
 0x240   : > { %2342 = vmatprep.subr.bf16.mxu0 %v2341_v43  ;;  %v642_v10 = vmax.f32 %v616_v44, 0.0  ;;  %v643_v48 = vmax.f32 %v618_v45, 0.0  ;;  %v3092_v44 = vld [vmem:[%s2766_s13 + $0xb0] sm:$0xff]  ;;  %v3095_v45 = vld [vmem:[%s2766_s13 + $0xb8] sm:$0xff] }
 0x241   : > { %v478_v51 = vpop.permute.xlu1 %477  ;;  %2344 = vmatpush1.bf16.msra.mxu0 %v2343_v57  ;;  %v2393_v57 = vpack.c.bf16 %v3029_v0, %v2112_v56 }
 0x242   : > { %v610_v52 = vadd.f32 %v609_v18, %v478_v51  ;;  %v612_v8 = vadd.f32 %v611_v20, %v478_v51 }
 0x243   : > { %2394 = vmatprep.subr.bf16.mxu1 %v2393_v57 }
 0x244   : > { %v640_v49 = vmax.f32 %v610_v52, 0.0  ;;  %v641_v3 = vmax.f32 %v612_v8, 0.0  ;;  %v3100_v52 = vld [vmem:[%s2766_s13 + $0xa0] sm:$0xff]  ;;  %v3103_v8 = vld [vmem:[%s2766_s13 + $0xa8] sm:$0xff] }
 0x245   : > { %v493_v5 = vpop.permute.xlu1 %492  ;;  %v2399_v0 = vpack.c.bf16 %v3092_v44, %v3100_v52 }
 0x246   : > { %v2347_v50 = vpack.c.bf16 %v642_v10, %v640_v49  ;;  %v2345_v53 = vpack.c.bf16 %v643_v48, %v641_v3  ;;  %v628_v7 = vadd.f32 %v627_v54, %v493_v5  ;;  %v630_v13 = vadd.f32 %v629_v61, %v493_v5  ;;  %v3065_v54 = vld [vmem:[%s3558_s4 + $0x18] sm:$0xff]  ;;  %v3111_v48 = vpop.f32.mrb[16].mxu1 }
 0x247   : > { %v1186_v10 = vmax.f32 %v3100_v52, %v3103_v8  ;;  %v3113_v49 = vpop.f32.mrb[17].mxu1 }
 0x248   : > { %2346 = vmatprep.subr.bf16.mxu0 %v2345_v53  ;;  %v646_v32 = vmax.f32 %v628_v7, 0.0  ;;  %v647_v17 = vmax.f32 %v630_v13, 0.0  ;;  %v3115_v3 = vpop.f32.mrb[18].mxu1 }
 0x249   : > { %v488_v14 = vpop.permute.xlu1 %487  ;;  %2348 = vmatpush1.bf16.msra.mxu0 %v2347_v50  ;;  %v3117_v5 = vpop.f32.mrb[19].mxu1 }
 0x24a   : > { %v622_v15 = vadd.f32 %v621_v46, %v488_v14  ;;  %v624_v30 = vadd.f32 %v623_v47, %v488_v14  ;;  %v3049_v46 = vld [vmem:[%s3558_s4 + $0x8] sm:$0xff]  ;;  %v3057_v47 = vld [vmem:[%s3558_s4 + $0x10] sm:$0xff] }
 0x24c   : > { %v644_v19 = vmax.f32 %v622_v15, 0.0  ;;  %v645_v29 = vmax.f32 %v624_v30, 0.0 }
 0x24e   : > { %v2351_v18 = vpack.c.bf16 %v646_v32, %v644_v19  ;;  %v2349_v20 = vpack.c.bf16 %v647_v17, %v645_v29 }
 0x250   : > { %2350 = vmatprep.subr.bf16.mxu0 %v2349_v20 }
 0x251   : > { %2352 = vmatpush1.bf16.msra.mxu0 %v2351_v18 }
 0x254   : > { %2071 = vmatmul.mubr.msk.f32.vlgmr.msra.gmra.mrb[8].mxu0 %vm668_vm1, %v3041_v34 }
 0x255   : > { %751 = vmatprep.mubr.f32.mxu0 %v3562_v16 }
 0x258   : > { %2072 = vmatmul.mubr.msk.f32.gmra.mrb[10].mxu0 %vm668_vm1, %v3049_v46 }
 0x259   : > { %757 = vmatprep.mubr.f32.mxu0 %v3562_v16 }
 0x25c   : > { %2073 = vmatmul.mubr.msk.f32.gmra.mrb[12].mxu0 %vm668_vm1, %v3057_v47 }
 0x25d   : > { %763 = vmatprep.mubr.f32.mxu0 %v3562_v16 }
 0x25f   : > { %v792_v61 = vpop.xlane.xlu0 %791 }
 0x260   : > { %v2353_v42 = vpack.c.bf16 %v792_v61, %v3033_v6  ;;  %2074 = vmatmul.mubr.msk.f32.gmra.mrb[14].mxu0 %vm668_vm1, %v3065_v54  ;;  %v2111_v6 = vld [vmem:[%s2766_s13 + $0x80] sm:$0xff]  ;;  %v1022_v61 = vpop.f32.mrb[20].mxu1 }
 0x261   : > { %2269 = vmatprep.mubr.msk.f32.mxu0 %vm325_vm0, %v2783_v12  ;;  %v1180_v4 = vmax.f32 %v2111_v6, %v2112_v56  ;;  %v2395_v43 = vpack.c.bf16 %v3026_v63, %v2111_v6  ;;  %v2397_v63 = vpack.c.bf16 %v3095_v45, %v3103_v8 }
 0x262   : > { %2354 = vmatprep.subr.bf16.mxu0 %v2353_v42 }
 0x263   : > { %2356 = vmatpush3.bf16.msra.mxu0 %v2353_v42  ;;  %v795_v58 = vpop.xlane.xlu0 %794  ;;  %1181 = vmax.xlane.f32.xlu1 %v1180_v4 }
 0x264   : > { %2396 = vmatpush1.bf16.msra.mxu1 %v2395_v43 }
 0x265   : > { %2398 = vmatprep.subr.bf16.mxu1 %v2397_v63 }
 0x268   : > { %2400 = vmatpush1.bf16.msra.mxu1 %v2399_v0 }
 0x26b   : > { %2127 = vmatmul.mubr.msk.f32.vlgmr.msra.gmra.mrb[32].mxu1 %vm325_vm0, %v2796_v21 }
 0x26c   : > { %1407 = vmatprep.mubr.f32.mxu1 %v3562_v16 }
 0x26f   : > { %2128 = vmatmul.mubr.msk.f32.gmra.mrb[34].mxu1 %vm325_vm0, %v2804_v22 }
 0x270   : > { %1413 = vmatprep.mubr.f32.mxu1 %v3562_v16 }
 0x273   : > { %2129 = vmatmul.mubr.msk.f32.gmra.mrb[36].mxu1 %vm325_vm0, %v2812_v23 }
 0x274   : > { %1419 = vmatprep.mubr.f32.mxu1 %v3562_v16 }
 0x277   : > { %2130 = vmatmul.mubr.msk.f32.gmra.mrb[38].mxu1 %vm325_vm0, %v2820_v24 }
 0x278   : > { %1425 = vmatprep.mubr.f32.mxu1 %v3562_v16 }
 0x27b   : > { %v798_v2 = vpop.xlane.xlu1 %797  ;;  %2131 = vmatmul.mubr.msk.f32.gmra.mrb[40].mxu1 %vm325_vm0, %v2828_v25 }
 0x27c   : > { %v2357_v62 = vpack.c.bf16 %v798_v2, %v795_v58  ;;  %1431 = vmatprep.mubr.f32.mxu1 %v3562_v16  ;;  %v1024_v2 = vpop.f32.mrb[21].mxu1 }
 0x27d   : > { %v1028_v6 = vpop.f32.mrb[22].mxu1 }
 0x27e   : > { %2358 = vmatprep.subr.bf16.mxu0 %v2357_v62  ;;  %v1030_v56 = vpop.f32.mrb[23].mxu1 }
 0x27f   : > { %2360 = vmatpush3.bf16.msra.mxu0 %v2357_v62  ;;  %2132 = vmatmul.mubr.msk.f32.gmra.mrb[42].mxu1 %vm325_vm0, %v2836_v26  ;;  %v1034_v63 = vpop.f32.mrb[24].mxu1 }
 0x280   : > { %1437 = vmatprep.mubr.f32.mxu1 %v3562_v16 }
 0x282   : > { %2270 = vmatmul.mubr.msk.f32.vlgmr.msra.gmra.mrb[16].mxu0 %vm325_vm0, %v2860_v35 }
 0x283   : > { %2272 = vmatprep.mubr.msk.f32.mxu0 %vm325_vm0, %v2865_v36  ;;  %2133 = vmatmul.mubr.msk.f32.gmra.mrb[44].mxu1 %vm325_vm0, %v2844_v27 }
 0x284   : > { %1443 = vmatprep.mubr.f32.mxu1 %v3562_v16 }
 0x286   : > { %2273 = vmatmul.mubr.msk.f32.gmra.mrb[18].mxu0 %vm325_vm0, %v2874_v37 }
 0x287   : > { %2275 = vmatprep.mubr.msk.f32.mxu0 %vm325_vm0, %v2879_v38  ;;  %2134 = vmatmul.mubr.msk.f32.gmra.mrb[46].mxu1 %vm325_vm0, %v2852_v28 }
 0x288   : > { %1794 = vmatprep.mubr.f32.mxu1 %v3562_v16 }
 0x28a   : > { %2276 = vmatmul.mubr.msk.f32.gmra.mrb[20].mxu0 %vm325_vm0, %v2888_v39 }
 0x28b   : > { %2278 = vmatprep.mubr.msk.f32.mxu0 %vm325_vm0, %v2893_v40 }
 0x28e   : > { %2279 = vmatmul.mubr.msk.f32.gmra.mrb[22].mxu0 %vm325_vm0, %v2902_v41 }
 0x28f   : > { %1137 = vmatprep.mubr.f32.mxu0 %v3562_v16 }
 0x327   : > { %v3137_v50 = vpop.f32.mrb[8].mxu0 }
 0x328   : > { %3581 = vst [vmem:[#allocation12_spill] sm:$0xff] %v3137_v50  ;;  %v3141_v53 = vpop.f32.mrb[9].mxu0 }
 0x329   : > { %3582 = vst [vmem:[#allocation13_spill] sm:$0xff] %v3141_v53 }
 0x32b   : > { %v3144_v7 = vpop.f32.mrb[10].mxu0 }
 0x32c   : > { %3583 = vst [vmem:[#allocation14_spill] sm:$0xff] %v3144_v7  ;;  %v3148_v13 = vpop.f32.mrb[11].mxu0 }
 0x32d   : > { %3584 = vst [vmem:[#allocation15_spill] sm:$0xff] %v3148_v13 }
 0x32f   : > { %v3151_v14 = vpop.f32.mrb[12].mxu0 }
 0x330   : > { %3585 = vst [vmem:[#allocation16_spill] sm:$0xff] %v3151_v14  ;;  %v3153_v15 = vpop.f32.mrb[13].mxu0 }
 0x331   : > { %3586 = vst [vmem:[#allocation17_spill] sm:$0xff] %v3153_v15 }
 0x333   : > { %v3155_v30 = vpop.f32.mrb[14].mxu0 }
 0x334   : > { %3587 = vst [vmem:[#allocation18_spill] sm:$0xff] %v3155_v30  ;;  %v3157_v32 = vpop.f32.mrb[15].mxu0 }
 0x335   : > { %3588 = vst [vmem:[#allocation19_spill] sm:$0xff] %v3157_v32 }
 0x355   : > { %v2271_v17 = vpop.f32.mrb[16].mxu0 }
 0x356   : > { %v871_v19 = vadd.f32 %v2271_v17, %v2971_v59  ;;  %v865_v29 = vpop.f32.mrb[17].mxu0  ;;  %v1036_v17 = vpop.f32.mrb[25].mxu1 }
 0x357   : > { %v866_v18 = vadd.f32 %v865_v29, %v2976_v60 }
 0x358   : > { %911 = vperm.xlu1 %2501, %v871_v19   ;;  %v1040_v19 = vpop.f32.mrb[26].mxu1 }
 0x359   : > { %v2274_v20 = vpop.f32.mrb[18].mxu0  ;;  %906 = vperm.xlu0 %2502, %v866_v18   ;;  %v1042_v18 = vpop.f32.mrb[27].mxu1 }
 0x35a   : > { %v881_v42 = vadd.f32 %v2274_v20, %v2983_v1  ;;  %v875_v58 = vpop.f32.mrb[19].mxu0  ;;  %v1046_v16 = vpop.f32.mrb[28].mxu1 }
 0x35b   : > { %v876_v62 = vadd.f32 %v875_v58, %v2989_v9 }
 0x35d   : > { %v2277_v4 = vpop.f32.mrb[20].mxu0  ;;  %916 = vperm.xlu1 %2501, %v876_v62   ;;  %921 = vperm.xlu0 %2502, %v881_v42   ;;  %v1048_v62 = vpop.f32.mrb[29].mxu1 }
 0x35e   : > { %v891_v57 = vadd.f32 %v2277_v4, %v2994_v11  ;;  %v885_v43 = vpop.f32.mrb[21].mxu0  ;;  %v1052_v4 = vpop.f32.mrb[30].mxu1 }
 0x35f   : > { %v886_v0 = vadd.f32 %v885_v43, %v3001_v31  ;;  %v1054_v51 = vpop.f32.mrb[31].mxu1  ;;  %v3589_v43 = vmax.f32 %v3092_v44, %v3095_v45 }
 0x361   : > { %v2280_v29 = vpop.f32.mrb[22].mxu0  ;;  %926 = vperm.xlu1 %2501, %v886_v0   ;;  %931 = vperm.xlu0 %2502, %v891_v57   ;;  %v3174_v57 = vld [vmem:[%s2766_s13 + $0xd0] sm:$0xff]  ;;  %v3177_v0 = vld [vmem:[%s2766_s13 + $0xd8] sm:$0xff] }
 0x362   : > { %v901_v20 = vadd.f32 %v2280_v29, %v3006_v33  ;;  %v895_v58 = vpop.f32.mrb[23].mxu0  ;;  %v1576_v29 = vmax.f32 %v3174_v57, %v3177_v0 }
 0x363   : > { %v896_v42 = vadd.f32 %v895_v58, %v3013_v55  ;;  %v1182_v58 = vpop.xlane.xlu1 %1181 }
 0x365   : > { %936 = vperm.xlu1 %2501, %v896_v42   ;;  %941 = vperm.xlu0 %2502, %v901_v20   ;;  %v1185_v42 = vpop.xlane.xlu0 %1184 }
 0x384   : > { %1187 = vmax.xlane.f32.xlu0 %v1186_v10 }
 0x388   : > { %1577 = vmax.xlane.f32.xlu0 %v1576_v29 }
 0x389   : > { %1190 = vmax.xlane.f32.xlu1 %v3589_v43 }
 0x3d7   : > { %v912_v20 = vpop.permute.xlu1 %911 }
 0x3d8   : > { %v1017_v32 = vadd.f32 %v3115_v3, %v912_v20  ;;  %v1019_v52 = vadd.f32 %v3117_v5, %v912_v20  ;;  %v907_v8 = vpop.permute.xlu0 %906 }
 0x3d9   : > { %v1011_v10 = vadd.f32 %v3111_v48, %v907_v8  ;;  %v1013_v44 = vadd.f32 %v3113_v49, %v907_v8 }
 0x3da   : > { %v1059_v45 = vmax.f32 %v1017_v32, 0.0  ;;  %v1060_v43 = vmax.f32 %v1019_v52, 0.0 }
 0x3db   : > { %v1057_v30 = vmax.f32 %v1011_v10, 0.0  ;;  %v1058_v15 = vmax.f32 %v1013_v44, 0.0 }
 0x3dc   : > { %v917_v14 = vpop.permute.xlu1 %916  ;;  %v922_v13 = vpop.permute.xlu0 %921 }
 0x3dd   : > { %v2371_v7 = vpack.c.bf16 %v1059_v45, %v1057_v30  ;;  %v1023_v29 = vadd.f32 %v1022_v61, %v917_v14  ;;  %v1025_v53 = vadd.f32 %v1024_v2, %v917_v14  ;;  %v1029_v50 = vadd.f32 %v1028_v6, %v922_v13 }
 0x3de   : > { %v1031_v55 = vadd.f32 %v1030_v56, %v922_v13  ;;  %v2369_v33 = vpack.c.bf16 %v1060_v43, %v1058_v15  ;;  %v3237_v43 = vpop.f32.mrb[32].mxu1 }
 0x3df   : > { %v1061_v3 = vmax.f32 %v1023_v29, 0.0  ;;  %v1062_v31 = vmax.f32 %v1025_v53, 0.0  ;;  %v1063_v5 = vmax.f32 %v1029_v50, 0.0  ;;  %v3239_v29 = vpop.f32.mrb[33].mxu1 }
 0x3e0   : > { %v1064_v20 = vmax.f32 %v1031_v55, 0.0  ;;  %2370 = vmatprep.subr.bf16.mxu0 %v2369_v33  ;;  %v927_v48 = vpop.permute.xlu1 %926  ;;  %v932_v11 = vpop.permute.xlu0 %931 }
 0x3e1   : > { %v2375_v49 = vpack.c.bf16 %v1063_v5, %v1061_v3  ;;  %v1035_v32 = vadd.f32 %v1034_v63, %v927_v48  ;;  %v1037_v52 = vadd.f32 %v1036_v17, %v927_v48  ;;  %2372 = vmatpush1.bf16.msra.mxu0 %v2371_v7  ;;  %v1041_v8 = vadd.f32 %v1040_v19, %v932_v11  ;;  %v3241_v3 = vpop.f32.mrb[34].mxu1 }
 0x3e2   : > { %v1043_v10 = vadd.f32 %v1042_v18, %v932_v11  ;;  %v2373_v44 = vpack.c.bf16 %v1064_v20, %v1062_v31  ;;  %v2385_v18 = vpack.c.bf16 %v1185_v42, %v1182_v58  ;;  %v3221_v58 = vld [vmem:[%s2766_s13 + $0xf8] sm:$0xff]  ;;  %v3229_v42 = vld [vmem:[%s2766_s13 + $0xe8] sm:$0xff]  ;;  %v3243_v5 = vpop.f32.mrb[35].mxu1 }
 0x3e3   : > { %v1065_v30 = vmax.f32 %v1035_v32, 0.0  ;;  %v1066_v61 = vmax.f32 %v1037_v52, 0.0  ;;  %v1067_v14 = vmax.f32 %v1041_v8, 0.0 }
 0x3e4   : > { %v1068_v2 = vmax.f32 %v1043_v10, 0.0  ;;  %2374 = vmatprep.subr.bf16.mxu0 %v2373_v44  ;;  %v937_v13 = vpop.permute.xlu1 %936  ;;  %v942_v15 = vpop.permute.xlu0 %941 }
 0x3e5   : > { %v2379_v53 = vpack.c.bf16 %v1067_v14, %v1065_v30  ;;  %v1047_v50 = vadd.f32 %v1046_v16, %v937_v13  ;;  %v1049_v55 = vadd.f32 %v1048_v62, %v937_v13  ;;  %2376 = vmatpush1.bf16.msra.mxu0 %v2375_v49  ;;  %v1053_v33 = vadd.f32 %v1052_v4, %v942_v15  ;;  %v1415_v44 = vpop.f32.mrb[36].mxu1 }
 0x3e6   : > { %v1055_v6 = vadd.f32 %v1054_v51, %v942_v15  ;;  %v2377_v56 = vpack.c.bf16 %v1068_v2, %v1066_v61  ;;  %v3590_v16 = vmov 0.0   ;;  %v1417_v61 = vpop.f32.mrb[37].mxu1  ;;  %v3591_v15 = vld [vmem:[#allocation8_spill] sm:$0xff] }
 0x3e7   : > { %v1069_v63 = vmax.f32 %v1047_v50, 0.0  ;;  %v1070_v17 = vmax.f32 %v1049_v55, 0.0  ;;  %v1071_v7 = vmax.f32 %v1053_v33, 0.0  ;;  %v1421_v14 = vpop.f32.mrb[38].mxu1  ;;  %v3592_v33 = vld [vmem:[#allocation9_spill] sm:$0xff] }
 0x3e8   : > { %v1072_v19 = vmax.f32 %v1055_v6, 0.0  ;;  %2378 = vmatprep.subr.bf16.mxu0 %v2377_v56  ;;  %v1423_v13 = vpop.f32.mrb[39].mxu1 }
 0x3e9   : > { %v2383_v11 = vpack.c.bf16 %v1071_v7, %v1069_v63  ;;  %2380 = vmatpush1.bf16.msra.mxu0 %v2379_v53  ;;  %v1427_v55 = vpop.f32.mrb[40].mxu1 }
 0x3ea   : > { %v2381_v31 = vpack.c.bf16 %v1072_v19, %v1070_v17  ;;  %v1429_v56 = vpop.f32.mrb[41].mxu1  ;;  %v3593_v19 = vld [vmem:[#allocation10_spill] sm:$0xff] }
 0x3eb   : > { %v1433_v63 = vpop.f32.mrb[42].mxu1 }
 0x3ec   : > { %2382 = vmatprep.subr.bf16.mxu0 %v2381_v31  ;;  %v1435_v7 = vpop.f32.mrb[43].mxu1 }
 0x3ed   : > { %2384 = vmatpush1.bf16.msra.mxu0 %v2383_v11 }
 0x3ee   : > { %2386 = vmatprep.subr.bf16.mxu0 %v2385_v18 }
 0x3f0   : > { %2099 = vmatmul.mubr.msk.f32.vlgmr.msra.gmra.mrb[24].mxu0 %vm668_vm1, %v3041_v34 }
 0x3f1   : > { %2388 = vmatpush3.bf16.msra.mxu0 %v2385_v18  ;;  %1143 = vmatprep.mubr.f32.mxu0 %v3590_v16  ;;  %v1439_v18 = vpop.f32.mrb[44].mxu1 }
 0x3f4   : > { %2100 = vmatmul.mubr.msk.f32.gmra.mrb[26].mxu0 %vm668_vm1, %v3049_v46 }
 0x3f5   : > { %1149 = vmatprep.mubr.f32.mxu0 %v3590_v16 }
 0x3f8   : > { %2101 = vmatmul.mubr.msk.f32.gmra.mrb[28].mxu0 %vm668_vm1, %v3057_v47 }
 0x3f9   : > { %1155 = vmatprep.mubr.f32.mxu0 %v3590_v16 }
 0x3fc   : > { %2102 = vmatmul.mubr.msk.f32.gmra.mrb[30].mxu0 %vm668_vm1, %v3065_v54 }
 0x3fd   : > { %2289 = vmatprep.mubr.msk.f32.mxu0 %vm325_vm0, %v2783_v12  ;;  %v2147_v12 = vld [vmem:[%s2766_s13 + $0xc0] sm:$0xff] }
 0x411   : > { %v1188_v51 = vpop.xlane.xlu0 %1187 }
 0x416   : > { %v1191_v62 = vpop.xlane.xlu1 %1190 }
 0x417   : > { %v2389_v4 = vpack.c.bf16 %v1191_v62, %v1188_v51  ;;  %v3594_v51 = vld [vmem:[#allocation11_spill] sm:$0xff] }
 0x419   : > { %2390 = vmatprep.subr.bf16.mxu0 %v2389_v4 }
 0x41a   : > { %2392 = vmatpush3.bf16.msra.mxu0 %v2389_v4  ;;  %v1441_v4 = vpop.f32.mrb[45].mxu1 }
 0x41d   : > { %2290 = vmatmul.mubr.msk.f32.vlgmr.msra.gmra.mrb[32].mxu0 %vm325_vm0, %v2860_v35  ;;  %v2148_v35 = vld [vmem:[%s2766_s13 + $0xc8] sm:$0xff] }
 0x41e   : > { %2292 = vmatprep.mubr.msk.f32.mxu0 %vm325_vm0, %v2865_v36  ;;  %v1573_v36 = vmax.f32 %v2147_v12, %v2148_v35 }
 0x420   : > { %1574 = vmax.xlane.f32.xlu1 %v1573_v36 }
 0x421   : > { %2293 = vmatmul.mubr.msk.f32.gmra.mrb[34].mxu0 %vm325_vm0, %v2874_v37  ;;  %v2425_v37 = vpack.c.bf16 %v3177_v0, %v2148_v35 }
 0x422   : > { %2295 = vmatprep.mubr.msk.f32.mxu0 %vm325_vm0, %v2879_v38  ;;  %v2427_v38 = vpack.c.bf16 %v3174_v57, %v2147_v12  ;;  %v2429_v57 = vpack.c.bf16 %v3221_v58, %v3229_v42  ;;  %v1445_v12 = vpop.f32.mrb[46].mxu1 }
 0x423   : > { %2426 = vmatprep.subr.bf16.mxu1 %v2425_v37  ;;  %v1447_v35 = vpop.f32.mrb[47].mxu1  ;;  %v1578_v37 = vpop.xlane.xlu0 %1577 }
 0x424   : > { %2428 = vmatpush1.bf16.msra.mxu1 %v2427_v38 }
 0x425   : > { %2296 = vmatmul.mubr.msk.f32.gmra.mrb[36].mxu0 %vm325_vm0, %v2888_v39  ;;  %v3218_v39 = vld [vmem:[%s2766_s13 + $0xf0] sm:$0xff]  ;;  %2430 = vmatprep.subr.bf16.mxu1 %v2429_v57 }
 0x426   : > { %2298 = vmatprep.mubr.msk.f32.mxu0 %vm325_vm0, %v2893_v40  ;;  %v1582_v40 = vmax.f32 %v3218_v39, %v3221_v58 }
 0x429   : > { %2299 = vmatmul.mubr.msk.f32.gmra.mrb[38].mxu0 %vm325_vm0, %v2902_v41  ;;  %v3226_v41 = vld [vmem:[%s2766_s13 + $0xe0] sm:$0xff]  ;;  %s2549_s13 = sshll.u32 %s2618_s15, 4  ;;  %s2550_s13 = int_to_ptr.vmem [resolvable:$false] %s2549_s13 }
 0x42a   : > { %1530 = vmatprep.mubr.f32.mxu0 %v3590_v16  ;;  %v1579_v45 = vmax.f32 %v3226_v41, %v3229_v42  ;;  %v2431_v0 = vpack.c.bf16 %v3218_v39, %v3226_v41  ;;  %s2551_s17 = scalar_lea.vmem %s2550_s13, 8192  ;;  %p2552_p8 = scmp.lt.s32.totalorder %s3507_s18, %s2550_s13 }
 0x42b   : > { %p2553_p10 = scmp.lt.s32.totalorder %s2551_s17, %s2545_s7 }
 0x42c   : > { %2432 = vmatpush1.bf16.msra.mxu1 %v2431_v0 }
 0x42d   : > { %p2554_p0 = por %p2553_p10, %p2552_p8 }
 0x42f   : > { %2163 = vmatmul.mubr.msk.f32.vlgmr.msra.gmra.mrb[48].mxu1 %vm325_vm0, %v2796_v21  ;;  %p2555_p2 = pnand %p2554_p0, %p2548_p13 }
 0x430   : > { %1800 = vmatprep.mubr.f32.mxu1 %v3590_v16 }
 0x433   : > { %2164 = vmatmul.mubr.msk.f32.gmra.mrb[50].mxu1 %vm325_vm0, %v2804_v22 }
 0x434   : > { %1806 = vmatprep.mubr.f32.mxu1 %v3590_v16 }
 0x437   : > { %2165 = vmatmul.mubr.msk.f32.gmra.mrb[52].mxu1 %vm325_vm0, %v2812_v23 }
 0x438   : > { %1812 = vmatprep.mubr.f32.mxu1 %v3590_v16 }
 0x43b   : > { %2166 = vmatmul.mubr.msk.f32.gmra.mrb[54].mxu1 %vm325_vm0, %v2820_v24 }
 0x43c   : > { %1818 = vmatprep.mubr.f32.mxu1 %v3590_v16 }
 0x43f   : > { %2167 = vmatmul.mubr.msk.f32.gmra.mrb[56].mxu1 %vm325_vm0, %v2828_v25 }
 0x440   : > { %1824 = vmatprep.mubr.f32.mxu1 %v3590_v16 }
 0x443   : > { %2168 = vmatmul.mubr.msk.f32.gmra.mrb[58].mxu1 %vm325_vm0, %v2836_v26 }
 0x444   : > { %1830 = vmatprep.mubr.f32.mxu1 %v3590_v16 }
 0x447   : > { %2169 = vmatmul.mubr.msk.f32.gmra.mrb[60].mxu1 %vm325_vm0, %v2844_v27 }
 0x448   : > { %1836 = vmatprep.mubr.f32.mxu1 %v3590_v16 }
 0x44b   : > { %2170 = vmatmul.mubr.msk.f32.gmra.mrb[62].mxu1 %vm325_vm0, %v2852_v28 }
 0x4ad   : > { %v1575_v36 = vpop.xlane.xlu1 %1574 }
 0x4c3   : > { %v3265_v21 = vpop.f32.mrb[24].mxu0 }
 0x4c4   : > { %v3268_v22 = vpop.f32.mrb[25].mxu0 }
 0x4c7   : > { %v3272_v23 = vpop.f32.mrb[26].mxu0 }
 0x4c8   : > { %v3274_v24 = vpop.f32.mrb[27].mxu0 }
 0x4cb   : > { %v3276_v25 = vpop.f32.mrb[28].mxu0 }
 0x4cc   : > { %v3278_v26 = vpop.f32.mrb[29].mxu0 }
 0x4cf   : > { %v3280_v20 = vpop.f32.mrb[30].mxu0 }
 0x4d0   : > { %v3282_v27 = vpop.f32.mrb[31].mxu0 }
 0x4f0   : > { %v2291_v48 = vpop.f32.mrb[32].mxu0 }
 0x4f1   : > { %v1264_v49 = vadd.f32 %v2291_v48, %v2971_v59  ;;  %v1258_v32 = vpop.f32.mrb[33].mxu0 }
 0x4f2   : > { %v1259_v52 = vadd.f32 %v1258_v32, %v2976_v60 }
 0x4f3   : > { %1304 = vperm.xlu1 %2501, %v1264_v49  }
 0x4f4   : > { %v2294_v28 = vpop.f32.mrb[34].mxu0  ;;  %1299 = vperm.xlu0 %2502, %v1259_v52  }
 0x4f5   : > { %v1274_v8 = vadd.f32 %v2294_v28, %v2983_v1  ;;  %v1268_v10 = vpop.f32.mrb[35].mxu0 }
 0x4f6   : > { %v1269_v30 = vadd.f32 %v1268_v10, %v2989_v9 }
 0x4f8   : > { %v2297_v2 = vpop.f32.mrb[36].mxu0  ;;  %1309 = vperm.xlu1 %2501, %v1269_v30   ;;  %1314 = vperm.xlu0 %2502, %v1274_v8  }
 0x4f9   : > { %v1284_v53 = vadd.f32 %v2297_v2, %v3591_v15  ;;  %v1278_v50 = vpop.f32.mrb[37].mxu0 }
 0x4fa   : > { %v1279_v6 = vadd.f32 %v1278_v50, %v3592_v33 }
 0x4fc   : > { %v2300_v17 = vpop.f32.mrb[38].mxu0  ;;  %1319 = vperm.xlu1 %2501, %v1279_v6   ;;  %1324 = vperm.xlu0 %2502, %v1284_v53  }
 0x4fd   : > { %v1294_v11 = vadd.f32 %v2300_v17, %v3593_v19  ;;  %v1288_v31 = vpop.f32.mrb[39].mxu0 }
 0x4fe   : > { %v1289_v62 = vadd.f32 %v1288_v31, %v3594_v51 }
 0x500   : > { %1329 = vperm.xlu1 %2501, %v1289_v62   ;;  %1334 = vperm.xlu0 %2502, %v1294_v11  }
 0x51f   : > { %1580 = vmax.xlane.f32.xlu0 %v1579_v45 }
 0x524   : > { %1583 = vmax.xlane.f32.xlu1 %v1582_v40 }
 0x572   : > { %v1305_v38 = vpop.permute.xlu1 %1304 }
 0x573   : > { %v1410_v57 = vadd.f32 %v3241_v3, %v1305_v38  ;;  %v1412_v0 = vadd.f32 %v3243_v5, %v1305_v38  ;;  %v1300_v48 = vpop.permute.xlu0 %1299 }
 0x574   : > { %v1404_v49 = vadd.f32 %v3237_v43, %v1300_v48  ;;  %v1406_v32 = vadd.f32 %v3239_v29, %v1300_v48 }
 0x575   : > { %v1452_v52 = vmax.f32 %v1410_v57, 0.0  ;;  %v1453_v28 = vmax.f32 %v1412_v0, 0.0 }
 0x576   : > { %v1450_v41 = vmax.f32 %v1404_v49, 0.0  ;;  %v1451_v42 = vmax.f32 %v1406_v32, 0.0 }
 0x577   : > { %v1310_v45 = vpop.permute.xlu1 %1309  ;;  %v1315_v8 = vpop.permute.xlu0 %1314 }
 0x578   : > { %v2403_v39 = vpack.c.bf16 %v1452_v52, %v1450_v41  ;;  %v1416_v58 = vadd.f32 %v1415_v44, %v1310_v45  ;;  %v1418_v40 = vadd.f32 %v1417_v61, %v1310_v45  ;;  %v1422_v10 = vadd.f32 %v1421_v14, %v1315_v8 }
 0x579   : > { %v1424_v30 = vadd.f32 %v1423_v13, %v1315_v8  ;;  %v2401_v2 = vpack.c.bf16 %v1453_v28, %v1451_v42  ;;  %v2417_v8 = vpack.c.bf16 %v1578_v37, %v1575_v36  ;;  %v2508_v36 = vld [vmem:[%s3556_s2 + $0x28] sm:$0xff]  ;;  %v2509_v37 = vld [vmem:[%s3556_s2 + $0x30] sm:$0xff] }
 0x57a   : > { %v1454_v3 = vmax.f32 %v1416_v58, 0.0  ;;  %v1455_v53 = vmax.f32 %v1418_v40, 0.0  ;;  %v1456_v5 = vmax.f32 %v1422_v10, 0.0  ;;  %v1796_v58 = vpop.f32.mrb[48].mxu1 }
 0x57b   : > { %v1457_v50 = vmax.f32 %v1424_v30, 0.0  ;;  %2402 = vmatprep.subr.bf16.mxu0 %v2401_v2  ;;  %v1320_v43 = vpop.permute.xlu1 %1319  ;;  %v1325_v6 = vpop.permute.xlu0 %1324 }
 0x57c   : > { %v2407_v29 = vpack.c.bf16 %v1456_v5, %v1454_v3  ;;  %v1428_v17 = vadd.f32 %v1427_v55, %v1320_v43  ;;  %v1430_v11 = vadd.f32 %v1429_v56, %v1320_v43  ;;  %2404 = vmatpush1.bf16.msra.mxu0 %v2403_v39  ;;  %v1434_v31 = vadd.f32 %v1433_v63, %v1325_v6  ;;  %v2510_v39 = vld [vmem:[%s3556_s2 + $0x38] sm:$0xff]  ;;  %v1798_v40 = vpop.f32.mrb[49].mxu1 }
 0x57d   : > { %v1436_v62 = vadd.f32 %v1435_v7, %v1325_v6  ;;  %v2405_v38 = vpack.c.bf16 %v1457_v50, %v1455_v53  ;;  %v1802_v10 = vpop.f32.mrb[50].mxu1 }
 0x57e   : > { %v1458_v57 = vmax.f32 %v1428_v17, 0.0  ;;  %v1459_v44 = vmax.f32 %v1430_v11, 0.0  ;;  %v1460_v61 = vmax.f32 %v1434_v31, 0.0  ;;  %v1804_v30 = vpop.f32.mrb[51].mxu1 }
 0x57f   : > { %v1461_v14 = vmax.f32 %v1436_v62, 0.0  ;;  %2406 = vmatprep.subr.bf16.mxu0 %v2405_v38  ;;  %v1330_v13 = vpop.permute.xlu1 %1329  ;;  %v1335_v0 = vpop.permute.xlu0 %1334 }
 0x580   : > { %v2411_v48 = vpack.c.bf16 %v1460_v61, %v1458_v57  ;;  %v1440_v49 = vadd.f32 %v1439_v18, %v1330_v13  ;;  %v1442_v32 = vadd.f32 %v1441_v4, %v1330_v13  ;;  %2408 = vmatpush1.bf16.msra.mxu0 %v2407_v29  ;;  %v1446_v52 = vadd.f32 %v1445_v12, %v1335_v0  ;;  %v3346_v2 = vpop.f32.mrb[52].mxu1 }
 0x581   : > { %v1448_v28 = vadd.f32 %v1447_v35, %v1335_v0  ;;  %v2409_v41 = vpack.c.bf16 %v1461_v14, %v1459_v44  ;;  %v2507_v35 = vld [vmem:[%s3556_s2 + $0x20] sm:$0xff]  ;;  %v3348_v3 = vpop.f32.mrb[53].mxu1 }
 0x582   : > { %v1462_v55 = vmax.f32 %v1440_v49, 0.0  ;;  %v1463_v56 = vmax.f32 %v1442_v32, 0.0  ;;  %v1464_v42 = vmax.f32 %v1446_v52, 0.0  ;;  %v3350_v53 = vpop.f32.mrb[54].mxu1 }
 0x583   : > { %v1465_v63 = vmax.f32 %v1448_v28, 0.0  ;;  %2410 = vmatprep.subr.bf16.mxu0 %v2409_v41  ;;  %v3352_v5 = vpop.f32.mrb[55].mxu1 }
 0x584   : > { %v2415_v7 = vpack.c.bf16 %v1464_v42, %v1462_v55  ;;  %2412 = vmatpush1.bf16.msra.mxu0 %v2411_v48  ;;  %v1820_v14 = vpop.f32.mrb[56].mxu1 }
 0x585   : > { %v2413_v45 = vpack.c.bf16 %v1465_v63, %v1463_v56  ;;  %v1822_v13 = vpop.f32.mrb[57].mxu1 }
 0x586   : > { %v1826_v52 = vpop.f32.mrb[58].mxu1 }
 0x587   : > { %2414 = vmatprep.subr.bf16.mxu0 %v2413_v45  ;;  %v1828_v28 = vpop.f32.mrb[59].mxu1 }
 0x588   : > { %2416 = vmatpush1.bf16.msra.mxu0 %v2415_v7  ;;  %v1832_v56 = vpop.f32.mrb[60].mxu1 }
 0x589   : > { %2418 = vmatprep.subr.bf16.mxu0 %v2417_v8  ;;  %v1834_v42 = vpop.f32.mrb[61].mxu1 }
 0x58a   : > { %v1838_v45 = vpop.f32.mrb[62].mxu1 }
 0x58b   : > { %2135 = vmatmul.mubr.msk.f32.vlgmr.msra.gmra.mrb[40].mxu0 %vm668_vm1, %v3041_v34  ;;  %v2503_v34 = vld [vmem:[%s3556_s2] sm:$0xff] }
 0x58c   : > { %2420 = vmatpush3.bf16.msra.mxu0 %v2417_v8  ;;  %1536 = vmatprep.mubr.f32.mxu0 %v3590_v16  ;;  %v1840_v8 = vpop.f32.mrb[63].mxu1 }
 0x58f   : > { %2136 = vmatmul.mubr.msk.f32.gmra.mrb[42].mxu0 %vm668_vm1, %v3049_v46  ;;  %v2504_v46 = vld [vmem:[%s3556_s2 + $0x8] sm:$0xff] }
 0x590   : > { %1542 = vmatprep.mubr.f32.mxu0 %v3590_v16 }
 0x593   : > { %2137 = vmatmul.mubr.msk.f32.gmra.mrb[44].mxu0 %vm668_vm1, %v3057_v47  ;;  %v2505_v47 = vld [vmem:[%s3556_s2 + $0x10] sm:$0xff] }
 0x594   : > { %1548 = vmatprep.mubr.f32.mxu0 %v3590_v16 }
 0x597   : > { %2138 = vmatmul.mubr.msk.f32.gmra.mrb[46].mxu0 %vm668_vm1, %v3065_v54  ;;  %v2506_v54 = vld [vmem:[%s3556_s2 + $0x18] sm:$0xff] }
 0x598   : > { %2309 = vmatprep.mubr.msk.f32.mxu0 %vm325_vm0, %v2503_v34 }
 0x5ac   : > { %v1581_v18 = vpop.xlane.xlu0 %1580 }
 0x5b1   : > { %v1584_v4 = vpop.xlane.xlu1 %1583 }
 0x5b2   : > { %v2421_v12 = vpack.c.bf16 %v1584_v4, %v1581_v18 }
 0x5b4   : > { %2422 = vmatprep.subr.bf16.mxu0 %v2421_v12 }
 0x5b5   : > { %2424 = vmatpush3.bf16.msra.mxu0 %v2421_v12 }
 0x5b8   : > { %2310 = vmatmul.mubr.msk.f32.vlgmr.msra.gmra.mrb[48].mxu0 %vm325_vm0, %v2504_v46 }
 0x5b9   : > { %2312 = vmatprep.mubr.msk.f32.mxu0 %vm325_vm0, %v2505_v47 }
 0x5bc   : > { %2313 = vmatmul.mubr.msk.f32.gmra.mrb[50].mxu0 %vm325_vm0, %v2506_v54 }
 0x5bd   : > { %2315 = vmatprep.mubr.msk.f32.mxu0 %vm325_vm0, %v2507_v35 }
 0x5c0   : > { %2316 = vmatmul.mubr.msk.f32.gmra.mrb[52].mxu0 %vm325_vm0, %v2508_v36 }
 0x5c1   : > { %2318 = vmatprep.mubr.msk.f32.mxu0 %vm325_vm0, %v2509_v37 }
 0x5c4   : > { %2319 = vmatmul.mubr.msk.f32.gmra.mrb[54].mxu0 %vm325_vm0, %v2510_v39 }
 0x5c5   : > { %1923 = vmatprep.mubr.f32.mxu0 %v3590_v16 }
 0x65e   : > { %v3354_v50 = vpop.f32.mrb[40].mxu0 }
 0x65f   : > { %v3356_v43 = vpop.f32.mrb[41].mxu0 }
 0x662   : > { %v3358_v6 = vpop.f32.mrb[42].mxu0 }
 0x663   : > { %v3360_v29 = vpop.f32.mrb[43].mxu0 }
 0x666   : > { %v3362_v17 = vpop.f32.mrb[44].mxu0 }
 0x667   : > { %v3364_v11 = vpop.f32.mrb[45].mxu0 }
 0x66a   : > { %v3366_v31 = vpop.f32.mrb[46].mxu0 }
 0x66b   : > { %v3368_v62 = vpop.f32.mrb[47].mxu0 }
 0x68b   : > { %v2311_v38 = vpop.f32.mrb[48].mxu0 }
 0x68c   : > { %v1657_v57 = vadd.f32 %v2311_v38, %v2971_v59  ;;  %v1651_v44 = vpop.f32.mrb[49].mxu0 }
 0x68d   : > { %v1652_v61 = vadd.f32 %v1651_v44, %v2976_v60 }
 0x68e   : > { %1697 = vperm.xlu1 %2501, %v1657_v57  }
 0x68f   : > { %v2314_v0 = vpop.f32.mrb[50].mxu0  ;;  %1692 = vperm.xlu0 %2502, %v1652_v61  }
 0x690   : > { %v1667_v48 = vadd.f32 %v2314_v0, %v2983_v1  ;;  %v1661_v49 = vpop.f32.mrb[51].mxu0 }
 0x691   : > { %v1662_v32 = vadd.f32 %v1661_v49, %v2989_v9 }
 0x693   : > { %v2317_v41 = vpop.f32.mrb[52].mxu0  ;;  %1702 = vperm.xlu1 %2501, %v1662_v32   ;;  %1707 = vperm.xlu0 %2502, %v1667_v48  }
 0x694   : > { %v1677_v59 = vadd.f32 %v2317_v41, %v3591_v15  ;;  %v1671_v55 = vpop.f32.mrb[53].mxu0  ;;  %v301_v15 = vld [vmem:[%s3559_s5] sm:$0xff] }
 0x695   : > { %v1672_v60 = vadd.f32 %v1671_v55, %v3592_v33  ;;  %v302_v33 = vld [vmem:[%s3559_s5 + $0x8] sm:$0xff] }
 0x697   : > { %v2320_v63 = vpop.f32.mrb[54].mxu0  ;;  %1712 = vperm.xlu1 %2501, %v1672_v60   ;;  %1717 = vperm.xlu0 %2502, %v1677_v59  }
 0x698   : > { %v1687_v1 = vadd.f32 %v2320_v63, %v3593_v19  ;;  %v1681_v7 = vpop.f32.mrb[55].mxu0  ;;  %v303_v19 = vld [vmem:[%s3559_s5 + $0x10] sm:$0xff] }
 0x699   : > { %v1682_v9 = vadd.f32 %v1681_v7, %v3594_v51  ;;  %v304_v51 = vld [vmem:[%s3559_s5 + $0x18] sm:$0xff] }
 0x69b   : > { %1722 = vperm.xlu1 %2501, %v1682_v9   ;;  %1727 = vperm.xlu0 %2502, %v1687_v1  }
 0x69f   : > { %650 = vperm.xlu1 %2501, %v301_v15   ;;  %655 = vperm.xlu0 %2502, %v302_v33  }
 0x6a3   : > { %660 = vperm.xlu1 %2501, %v303_v19   ;;  %665 = vperm.xlu0 %2502, %v304_v51  }
 0x70d   : > { %v1698_v34 = vpop.permute.xlu1 %1697 }
 0x70e   : > { %v1803_v18 = vadd.f32 %v1802_v10, %v1698_v34  ;;  %v1805_v4 = vadd.f32 %v1804_v30, %v1698_v34  ;;  %v1693_v12 = vpop.permute.xlu0 %1692 }
 0x70f   : > { %v1797_v46 = vadd.f32 %v1796_v58, %v1693_v12  ;;  %v1799_v47 = vadd.f32 %v1798_v40, %v1693_v12 }
 0x710   : > { %v1845_v54 = vmax.f32 %v1803_v18, 0.0  ;;  %v1846_v35 = vmax.f32 %v1805_v4, 0.0 }
 0x711   : > { %v1843_v36 = vmax.f32 %v1797_v46, 0.0  ;;  %v1844_v37 = vmax.f32 %v1799_v47, 0.0 }
 0x712   : > { %v1703_v39 = vpop.permute.xlu1 %1702  ;;  %v1708_v38 = vpop.permute.xlu0 %1707 }
 0x713   : > { %v2435_v57 = vpack.c.bf16 %v1845_v54, %v1843_v36  ;;  %v1809_v44 = vadd.f32 %v3346_v2, %v1703_v39  ;;  %v1811_v61 = vadd.f32 %v3348_v3, %v1703_v39  ;;  %v1815_v0 = vadd.f32 %v3350_v53, %v1708_v38  ;;  %v3595_v54 = vld [vmem:[#allocation12_spill] sm:$0xff]  ;;  %v3597_v39 = vld [vmem:[#allocation14_spill] sm:$0xff] }
 0x714   : > { %v1817_v48 = vadd.f32 %v3352_v5, %v1708_v38  ;;  %v2433_v10 = vpack.c.bf16 %v1846_v35, %v1844_v37 }
 0x715   : > { %v1847_v30 = vmax.f32 %v1809_v44, 0.0  ;;  %v1848_v49 = vmax.f32 %v1811_v61, 0.0  ;;  %v1849_v58 = vmax.f32 %v1815_v0, 0.0 }
 0x716   : > { %v1850_v40 = vmax.f32 %v1817_v48, 0.0  ;;  %2434 = vmatprep.subr.bf16.mxu0 %v2433_v10  ;;  %v1713_v32 = vpop.permute.xlu1 %1712  ;;  %v1718_v41 = vpop.permute.xlu0 %1717 }
 0x717   : > { %v2439_v59 = vpack.c.bf16 %v1849_v58, %v1847_v30  ;;  %v1821_v55 = vadd.f32 %v1820_v14, %v1713_v32  ;;  %v1823_v60 = vadd.f32 %v1822_v13, %v1713_v32  ;;  %2436 = vmatpush1.bf16.msra.mxu0 %v2435_v57  ;;  %v1827_v63 = vadd.f32 %v1826_v52, %v1718_v41 }
 0x718   : > { %v1829_v2 = vadd.f32 %v1828_v28, %v1718_v41  ;;  %v2437_v1 = vpack.c.bf16 %v1850_v40, %v1848_v49  ;;  %v3601_v40 = vld [vmem:[#allocation18_spill] sm:$0xff]  ;;  %v3602_v41 = vld [vmem:[#allocation19_spill] sm:$0xff] }
 0x719   : > { %v1851_v3 = vmax.f32 %v1821_v55, 0.0  ;;  %v1852_v7 = vmax.f32 %v1823_v60, 0.0  ;;  %v1853_v53 = vmax.f32 %v1827_v63, 0.0 }
 0x71a   : > { %v1854_v9 = vmax.f32 %v1829_v2, 0.0  ;;  %2438 = vmatprep.subr.bf16.mxu0 %v2437_v1  ;;  %v1723_v5 = vpop.permute.xlu1 %1722  ;;  %v1728_v15 = vpop.permute.xlu0 %1727 }
 0x71b   : > { %v2443_v33 = vpack.c.bf16 %v1853_v53, %v1851_v3  ;;  %v1833_v19 = vadd.f32 %v1832_v56, %v1723_v5  ;;  %v1835_v51 = vadd.f32 %v1834_v42, %v1723_v5  ;;  %2440 = vmatpush1.bf16.msra.mxu0 %v2439_v59  ;;  %v1839_v34 = vadd.f32 %v1838_v45, %v1728_v15  ;;  %v3596_v56 = vld [vmem:[#allocation13_spill] sm:$0xff] }
 0x71c   : > { %v1841_v18 = vadd.f32 %v1840_v8, %v1728_v15  ;;  %v2441_v4 = vpack.c.bf16 %v1854_v9, %v1852_v7 }
 0x71d   : > { %v1855_v14 = vmax.f32 %v1833_v19, 0.0  ;;  %v1857_v13 = vmax.f32 %v1839_v34, 0.0  ;;  %v1856_v52 = vmax.f32 %v1835_v51, 0.0 }
 0x71e   : > { %v1858_v28 = vmax.f32 %v1841_v18, 0.0  ;;  %2442 = vmatprep.subr.bf16.mxu0 %v2441_v4  ;;  %v3394_v12 = vpop.permute.xlu1 %650  ;;  %v3396_v46 = vpop.permute.xlu0 %655 }
 0x71f   : > { %v2447_v47 = vpack.c.bf16 %v1857_v13, %v1855_v14  ;;  %v748_v35 = vadd.f32 %v3595_v54, %v3394_v12  ;;  %v750_v42 = vadd.f32 %v3596_v56, %v3394_v12  ;;  %v1140_v45 = vadd.f32 %v3265_v21, %v3394_v12  ;;  %2444 = vmatpush1.bf16.msra.mxu0 %v2443_v33  ;;  %v3598_v21 = vld [vmem:[#allocation15_spill] sm:$0xff] }
 0x720   : > { %v1142_v8 = vadd.f32 %v3268_v22, %v3394_v12  ;;  %v1533_v36 = vadd.f32 %v3354_v50, %v3394_v12  ;;  %v1535_v37 = vadd.f32 %v3356_v43, %v3394_v12  ;;  %v754_v38 = vadd.f32 %v3597_v39, %v3396_v46 }
 0x721   : > { %770 = vst [vmem:[%s3414_s14] sm:$0xff] %v748_v35  ;;  %771 = vst [vmem:[%s3414_s14 + $0x8] sm:$0xff] %v750_v42  ;;  %v756_v22 = vadd.f32 %v3598_v21, %v3396_v46  ;;  %v1146_v50 = vadd.f32 %v3272_v23, %v3396_v46  ;;  %v1148_v43 = vadd.f32 %v3274_v24, %v3396_v46  ;;  %v3599_v23 = vld [vmem:[#allocation16_spill] sm:$0xff] }
 0x722   : > { %2103 = vst [vmem:[%s3414_s14 + $0x40] sm:$0xff] %v1140_v45  ;;  %v1539_v57 = vadd.f32 %v3358_v6, %v3396_v46  ;;  %2104 = vst [vmem:[%s3414_s14 + $0x48] sm:$0xff] %v1142_v8  ;;  %v1541_v44 = vadd.f32 %v3360_v29, %v3396_v46  ;;  %v2445_v61 = vpack.c.bf16 %v1858_v28, %v1856_v52  ;;  %v661_v0 = vpop.permute.xlu1 %660  ;;  %v3433_v48 = vpop.permute.xlu0 %665  ;;  %v3600_v6 = vld [vmem:[#allocation17_spill] sm:$0xff] }
 0x723   : > { %2139 = vst [vmem:[%s3414_s14 + $0x80] sm:$0xff] %v1533_v36  ;;  %2140 = vst [vmem:[%s3414_s14 + $0x88] sm:$0xff] %v1535_v37  ;;  %v760_v24 = vadd.f32 %v3599_v23, %v661_v0  ;;  %v762_v10 = vadd.f32 %v3600_v6, %v661_v0  ;;  %v1152_v30 = vadd.f32 %v3276_v25, %v661_v0 }
 0x724   : > { %772 = vst [vmem:[%s3414_s14 + $0x10] sm:$0xff] %v754_v38  ;;  %773 = vst [vmem:[%s3414_s14 + $0x18] sm:$0xff] %v756_v22  ;;  %v1154_v29 = vadd.f32 %v3278_v26, %v661_v0  ;;  %2446 = vmatprep.subr.bf16.mxu0 %v2445_v61  ;;  %v1545_v49 = vadd.f32 %v3362_v17, %v661_v0  ;;  %v1547_v58 = vadd.f32 %v3364_v11, %v661_v0 }
 0x725   : > { %2105 = vst [vmem:[%s3414_s14 + $0x50] sm:$0xff] %v1146_v50  ;;  %2106 = vst [vmem:[%s3414_s14 + $0x58] sm:$0xff] %v1148_v43  ;;  %v766_v32 = vadd.f32 %v3601_v40, %v3433_v48  ;;  %v768_v25 = vadd.f32 %v3602_v41, %v3433_v48  ;;  %2448 = vmatpush1.bf16.msra.mxu0 %v2447_v47  ;;  %v1158_v26 = vadd.f32 %v3280_v20, %v3433_v48  ;;  %v2511_v20 = vld [vmem:[%s3558_s4] sm:$0xff] }
 0x726   : > { %2141 = vst [vmem:[%s3414_s14 + $0x90] sm:$0xff] %v1539_v57  ;;  %2142 = vst [vmem:[%s3414_s14 + $0x98] sm:$0xff] %v1541_v44  ;;  %v1160_v17 = vadd.f32 %v3282_v27, %v3433_v48  ;;  %v1551_v11 = vadd.f32 %v3366_v31, %v3433_v48  ;;  %v1553_v59 = vadd.f32 %v3368_v62, %v3433_v48  ;;  %v2512_v27 = vld [vmem:[%s3558_s4 + $0x8] sm:$0xff]  ;;  %v2513_v31 = vld [vmem:[%s3558_s4 + $0x10] sm:$0xff] }
 0x727   : > { %774 = vst [vmem:[%s3414_s14 + $0x20] sm:$0xff] %v760_v24  ;;  %775 = vst [vmem:[%s3414_s14 + $0x28] sm:$0xff] %v762_v10  ;;  %v2514_v62 = vld [vmem:[%s3558_s4 + $0x18] sm:$0xff] }
 0x728   : > { %2107 = vst [vmem:[%s3414_s14 + $0x60] sm:$0xff] %v1152_v30  ;;  %2108 = vst [vmem:[%s3414_s14 + $0x68] sm:$0xff] %v1154_v29  ;;  %2171 = vmatmul.mubr.msk.f32.vlgmr.msra.gmra.mrb[56].mxu0 %vm668_vm1, %v2511_v20 }
 0x729   : > { %2143 = vst [vmem:[%s3414_s14 + $0xa0] sm:$0xff] %v1545_v49  ;;  %2144 = vst [vmem:[%s3414_s14 + $0xa8] sm:$0xff] %v1547_v58  ;;  %1929 = vmatprep.mubr.f32.mxu0 %v3590_v16 }
 0x72a   : > { %776 = vst [vmem:[%s3414_s14 + $0x30] sm:$0xff] %v766_v32  ;;  %777 = vst [vmem:[%s3414_s14 + $0x38] sm:$0xff] %v768_v25 }
 0x72b   : > { %2109 = vst [vmem:[%s3414_s14 + $0x70] sm:$0xff] %v1158_v26  ;;  %2110 = vst [vmem:[%s3414_s14 + $0x78] sm:$0xff] %v1160_v17 }
 0x72c   : > { %2145 = vst [vmem:[%s3414_s14 + $0xb0] sm:$0xff] %v1551_v11  ;;  %2146 = vst [vmem:[%s3414_s14 + $0xb8] sm:$0xff] %v1553_v59  ;;  %2172 = vmatmul.mubr.msk.f32.gmra.mrb[58].mxu0 %vm668_vm1, %v2512_v27 }
 0x72d   : > { %1935 = vmatprep.mubr.f32.mxu0 %v3590_v16 }
 0x730   : > { %2173 = vmatmul.mubr.msk.f32.gmra.mrb[60].mxu0 %vm668_vm1, %v2513_v31 }
 0x731   : > { %1941 = vmatprep.mubr.f32.mxu0 %v3590_v16 }
 0x734   : > { %2174 = vmatmul.mubr.msk.f32.gmra.mrb[62].mxu0 %vm668_vm1, %v2514_v62 }
 0x7fb   : > { %v1925_v55 = vpop.f32.mrb[56].mxu0 }
 0x7fc   : > { %v1926_v60 = vadd.f32 %v1925_v55, %v3394_v12  ;;  %v1927_v63 = vpop.f32.mrb[57].mxu0 }
 0x7fd   : > { %v1928_v2 = vadd.f32 %v1927_v63, %v3394_v12 }
 0x7fe   : > { %2175 = vst [vmem:[%s3414_s14 + $0xc0] sm:$0xff] %v1926_v60 }
 0x7ff   : > { %2176 = vst [vmem:[%s3414_s14 + $0xc8] sm:$0xff] %v1928_v2  ;;  %v1931_v1 = vpop.f32.mrb[58].mxu0 }
 0x800   : > { %v1932_v16 = vadd.f32 %v1931_v1, %v3396_v46  ;;  %v1933_v3 = vpop.f32.mrb[59].mxu0 }
 0x801   : > { %v1934_v7 = vadd.f32 %v1933_v3, %v3396_v46 }
 0x802   : > { %2177 = vst [vmem:[%s3414_s14 + $0xd0] sm:$0xff] %v1932_v16 }
 0x803   : > { %2178 = vst [vmem:[%s3414_s14 + $0xd8] sm:$0xff] %v1934_v7  ;;  %v1937_v53 = vpop.f32.mrb[60].mxu0 }
 0x804   : > { %v1938_v9 = vadd.f32 %v1937_v53, %v661_v0  ;;  %v1939_v5 = vpop.f32.mrb[61].mxu0 }
 0x805   : > { %v1940_v15 = vadd.f32 %v1939_v5, %v661_v0 }
 0x806   : > { %2179 = vst [vmem:[%s3414_s14 + $0xe0] sm:$0xff] %v1938_v9 }
 0x807   : > { %2180 = vst [vmem:[%s3414_s14 + $0xe8] sm:$0xff] %v1940_v15  ;;  %v1943_v33 = vpop.f32.mrb[62].mxu0 }
 0x808   : > { %v1944_v19 = vadd.f32 %v1943_v33, %v3433_v48  ;;  %v1945_v51 = vpop.f32.mrb[63].mxu0 }
 0x809   : > { %v1946_v34 = vadd.f32 %v1945_v51, %v3433_v48 }
 0x80a   : > { %2181 = vst [vmem:[%s3414_s14 + $0xf0] sm:$0xff] %v1944_v19 }
 0x80b   : > { %2182 = vst [vmem:[%s3414_s14 + $0xf8] sm:$0xff] %v1946_v34 }
 0x80c   : > { %2558 = shalt.err (!%p2555_p2)
}
 0x80d   : > { %s2559_s14 = scalar_lea.hbm %s3505_s11, 4096  ;;  %s2563_s12 = scalar_lea.hbm %s3560_s6, 8192 }
 0x80e   : > { %p2560_p4 = scmp.ne.s32.totalorder %s3505_s11, %s2559_s14  ;;  %p2564_p9 = scmp.lt.u32.totalorder %s3505_s11, %s3560_s6 }
 0x80f   : > { %p2565_p1 = scmp.lt.u32.totalorder %s2563_s12, %s2559_s14  ;;  %p2567_p6 = scmp.lt.u32.totalorder %s2559_s14, %s3505_s11 }
 0x810   : > { %p2561_p5 = pnand %p2560_p4, %p3603_p11 }
 0x811   : > { %p2566_p3 = por %p2565_p1, %p2564_p9 }
 0x812   : > { %p2562_p7 = pneg %p2561_p5 }
 0x813   : > { %p2568_p12 = por %p2567_p6, %p2566_p3 }
 0x815   : > { %p2569_p13 = pnand %p2568_p12, %p2562_p7 }
 0x817   : > { %2572 = shalt.err (!%p2569_p13)
}
 0x818   : > { %s2619_s19 = smov 256   ;;  %s2620_s20 = smov 16  }
 0x819   : > { %2451 = dma.vmem_to_hbm [thread:$0]  (%p3603_p11), %s3507_s18, 4096, %s3505_s11, %s1958_s25, %s2619_s19, %s2619_s19, %s2620_s20  }
 0x81a PF: > { %s1987_s7 = sand.u32 1, %s2599_s21   ;;  %p3604_p8 = scmp.ne.s32.totalorder %s3575_s10, 0 }
 0x81b   : > { %p3605_p10 = scmp.ge.s32.totalorder %s2611_s24, 2  ;;  %s1988_s15 = scalar_lea.sflag [#allocation4], %s1987_s7 }
 0x81d   : > { %p2458_p0 = pnand %p3605_p10, %p3604_p8 }
 0x81f   : > { %2594 = dma.done.wait (!%p2458_p0), %s1988_s15, 4096  }
 0x820   : > { %2596 = vsyncadd (!%p2458_p0), %s1988_s15, 4294963200  ;;  %p19_p2 = scmp.ge.s32.totalorder %s2681_s27, 4   ;;  %s3606_s21 = smov %s2603_s22 }
 0x821   : > { %s3607_s22 = smov %s2607_s23  ;;  %s3608_s23 = smov %s2693_s30 }
 0x822   : > { %s3609_s24 = smov %s2681_s27  ;;  %21 = sbr.rel (!%p19_p2) target bundleno = 5 (0x5), region = 95 }
 0x829   :  { %1993 = vsyncpa [#allocation3], 1 }
 0x82a   :  { %1995 = vsyncpa [#allocation3 + $0x1], 1 }
 0x82b   :  { %1996 = vsyncpa [#allocation4], 1 }
 0x82c   :  { %1998 = vsyncpa [#allocation4 + $0x1], 1 }

</bundles_post_ra>
